<compile_context>
chip_gen: v7x
topology: tpu7x:2x2x1
jax: 0.10.0
libtpu: 0.0.40
codegen_flags: <defaults>
</compile_context>

<pallas_src>
import numpy as np
import jax
import jax.numpy as jnp
from jax.experimental import pallas as pl
from jax.experimental.pallas import tpu as pltpu


# ------------------------------ fused kernel ---------------------------------
def _follower_kernel(x_ref, w1_ref, b1_ref, w2_ref, b2_ref,
                     wf1_ref, bf1_ref, wf2_ref, bf2_ref, o_ref):
    # x_ref  : (Bb, 28, 128) f32 input, lanes [28,128) zero-padded
    # w1_ref : (640, 256) bf16 conv1 weight, rows = di*128 + w_in,
    #          cols = (j//2)*10 + c  (+128 for odd j)
    # b1_ref : (1, 256) f32 conv1 bias tiled per output column
    # w2_ref : (640, 256) bf16 conv2 weight, rows = di*128 + (j+dj)*10 + c_in
    # b2_ref : (1, 256) f32
    # wf1_ref: (4, 128, 50) bf16 fc1 weight, slab h, lane = w*20 + c
    # wf2_ref: (50, 10) bf16
    # o_ref  : (Bb, 1, 10) f32 logits
    Bb = x_ref.shape[0]
    f32 = jnp.float32
    bf16 = jnp.bfloat16
    x = x_ref[...]                                           # (Bb, 28, 128)

    # ---- conv1 (5x5 VALID) as ONE matmul, 128-lane-aligned K slabs ----------
    lhs1 = jnp.concatenate([x[:, di:di + 24, :] for di in range(5)], axis=-1)
    lhs1 = lhs1.reshape(Bb * 24, 640).astype(bf16)           # 24 % 8 == 0: free reshape
    z = jnp.dot(lhs1, w1_ref[...], preferred_element_type=f32) + b1_ref[...]
    z = z.reshape(Bb, 24, 256)

    # ---- 2x2 max-pool + ReLU -------------------------------------------------
    z = jnp.maximum(z[:, :, :128], z[:, :, 128:])            # W-pool: aligned vreg max
    z = z.reshape(Bb, 12, 2, 128)
    z1 = jnp.maximum(jnp.maximum(z[:, :, 0], z[:, :, 1]), 0.0)   # (Bb, 12, 128)

    # ---- conv2 (5x5 VALID) as ONE matmul ------------------------------------
    lhs2 = jnp.concatenate([z1[:, di:di + 8, :] for di in range(5)], axis=-1)
    lhs2 = lhs2.reshape(Bb * 8, 640).astype(bf16)            # 8 % 8 == 0: free reshape
    z = jnp.dot(lhs2, w2_ref[...], preferred_element_type=f32) + b2_ref[...]
    z = z.reshape(Bb, 8, 256)

    # ---- 2x2 max-pool + ReLU -------------------------------------------------
    z = jnp.maximum(z[:, :, :128], z[:, :, 128:])            # (Bb, 8, 128)
    z = z.reshape(Bb, 4, 2, 128)
    z2 = jnp.maximum(jnp.maximum(z[:, :, 0], z[:, :, 1]), 0.0)   # (Bb, 4, 128)

    # ---- MLP head: fc1 as 4 accumulated matmuls (no lane flatten), fc2 ------
    # TODO(synk): Dropout2d / F.dropout are identity in eval mode; train-mode
    # stochastic masking is not implemented.
    h = bf1_ref[...]                                         # (1, 50) f32
    for i in range(4):
        h = h + jnp.dot(z2[:, i, :].astype(bf16), wf1_ref[i],
                        preferred_element_type=f32)
    h = jnp.maximum(h, 0.0).astype(bf16)                     # (Bb, 50)
    o_ref[:, 0, :] = (jnp.dot(h, wf2_ref[...], preferred_element_type=f32)
                      + bf2_ref[...])


# -------------------- one-time host-side parameter packing -------------------
def prepare_params(params):
    w1, b1, w2, b2, wf1, bf1, wf2, bf2 = [np.asarray(p, np.float32) for p in params]

    # conv1: W1m[di*128 + (j+dj), col1(j) + c] = w1[c, 0, di, dj]
    #   col1(j) = (j//2)*10 + 128*(j%2)  -> even/odd-j halves are 128-lane aligned
    k1 = np.transpose(w1[:, 0], (1, 2, 0))                   # (di, dj, c) = (5,5,10)
    W1m = np.zeros((5, 128, 256), np.float32)
    for j in range(24):
        col = (j // 2) * 10 + 128 * (j % 2)
        W1m[:, j:j + 5, col:col + 10] = k1
    W1m = W1m.reshape(640, 256)
    b1t = np.zeros((1, 256), np.float32)
    b1t[0, :120] = np.tile(b1, 12)
    b1t[0, 128:248] = np.tile(b1, 12)

    # conv2: W2m[di*128 + (j+dj)*10 + c_in, col2(j) + c] = w2[c, c_in, di, dj]
    #   col2(j) = (j//2)*20 + 128*(j%2)
    k2 = np.transpose(w2, (2, 3, 1, 0))                      # (di, dj, c_in, c) = (5,5,10,20)
    W2m = np.zeros((5, 128, 256), np.float32)
    for j in range(8):
        col = (j // 2) * 20 + 128 * (j % 2)
        for dj in range(5):
            W2m[:, (j + dj) * 10:(j + dj) * 10 + 10, col:col + 20] = k2[:, dj]
    W2m = W2m.reshape(640, 256)
    b2t = np.zeros((1, 256), np.float32)
    b2t[0, :80] = np.tile(b2, 4)
    b2t[0, 128:208] = np.tile(b2, 4)

    # fc1: Wf1[h, w*20 + c, n] = wf1[n, c*16 + h*4 + w]  (NCHW flatten of PyTorch)
    # consumed as 4 accumulated (128 -> 50) matmuls, so no in-kernel flatten.
    wf1_chw = wf1.reshape(50, 20, 4, 4)                      # (n, c, h, w)
    Wf1 = np.zeros((4, 128, 50), np.float32)
    Wf1[:, :80, :] = np.transpose(wf1_chw, (2, 3, 1, 0)).reshape(4, 80, 50)
    Wf2 = wf2.T                                              # (50, 10)

    bf16 = jnp.bfloat16
    return (jnp.asarray(W1m, bf16), jnp.asarray(b1t, jnp.float32),
            jnp.asarray(W2m, bf16), jnp.asarray(b2t, jnp.float32),
            jnp.asarray(Wf1, bf16), jnp.asarray(bf1.reshape(1, 50), jnp.float32),
            jnp.asarray(Wf2, bf16), jnp.asarray(bf2.reshape(1, 10), jnp.float32))


def _tensorcores_per_chip() -> int:
    # v7x exposes 2 TensorCores per chip (megacore); v5e/v6e have 1.
    try:
        kind = jax.devices()[0].device_kind.lower()
    except Exception:
        return 1
    return 2 if ("v7" in kind or "7x" in kind) else 1


# ------------------------------ full forward ---------------------------------
def follower_forward(x_nchw, prep):
    W1m, b1t, W2m, b2t, Wf1, bf1, Wf2, bf2 = prep
    B = x_nchw.shape[0]
    # Drop Cin=1 and zero-pad W to a full 128-lane tile so the in-kernel im2col
    # slabs are 128-lane aligned vreg copies (input DMA is still tiny).
    x = jnp.pad(x_nchw.astype(jnp.float32).reshape(B, 28, 28),
                ((0, 0), (0, 0), (0, 100)))

    # Batch blocking: split across the two TensorCores only on v7x; on
    # single-TC chips (v5e/v6e) a split is pure per-step overhead. For large
    # batches, cap the per-block batch to keep f32 intermediates well inside
    # VMEM while keeping M = 24*Bb big enough to feed the MXU.
    Bb = B
    if _tensorcores_per_chip() == 2 and B % 2 == 0:
        Bb = B // 2
    while Bb > 128 and Bb % 2 == 0:
        Bb //= 2
    grid = (B // Bb,)

    out = pl.pallas_call(
        _follower_kernel,
        out_shape=jax.ShapeDtypeStruct((B, 1, 10), jnp.float32),
        grid=grid,
        in_specs=[
            pl.BlockSpec((Bb, 28, 128), lambda i: (i, 0, 0)),
            pl.BlockSpec((640, 256), lambda i: (0, 0)),
            pl.BlockSpec((1, 256), lambda i: (0, 0)),
            pl.BlockSpec((640, 256), lambda i: (0, 0)),
            pl.BlockSpec((1, 256), lambda i: (0, 0)),
            pl.BlockSpec((4, 128, 50), lambda i: (0, 0, 0)),
            pl.BlockSpec((1, 50), lambda i: (0, 0)),
            pl.BlockSpec((50, 10), lambda i: (0, 0)),
            pl.BlockSpec((1, 10), lambda i: (0, 0)),
        ],
        out_specs=pl.BlockSpec((Bb, 1, 10), lambda i: (i, 0, 0)),
        compiler_params=pltpu.CompilerParams(
            dimension_semantics=("parallel",)),
    )(x, W1m, b1t, W2m, b2t, Wf1, bf1, Wf2, bf2)
    return out.reshape(B, 10)


# ----------------------- pure-JAX reference (NCHW, f32) -----------------------
def _reference(x_nchw, params):
    w1, b1, w2, b2, wf1, bf1, wf2, bf2 = params
    dn = ('NCHW', 'OIHW', 'NCHW')
    hp = jax.lax.Precision.HIGHEST

    def conv_block(y, w, b):
        y = jax.lax.conv_general_dilated(y, w, (1, 1), 'VALID',
                                         dimension_numbers=dn, precision=hp)
        y = y + b[None, :, None, None]
        y = jax.lax.reduce_window(y, -jnp.inf, jax.lax.max,
                                  (1, 1, 2, 2), (1, 1, 2, 2), 'VALID')
        return jnp.maximum(y, 0.0)

    y = conv_block(x_nchw, w1, b1)
    y = conv_block(y, w2, b2)
    y = y.reshape(y.shape[0], -1)
    y = jnp.maximum(jnp.dot(y, wf1.T, precision=hp) + bf1, 0.0)
    return jnp.dot(y, wf2.T, precision=hp) + bf2


if __name__ == "__main__":
    key = jax.random.PRNGKey(0)
    ks = jax.random.split(key, 9)

    def u(k, shape, fan_in):
        lim = 1.0 / np.sqrt(fan_in)
        return jax.random.uniform(k, shape, jnp.float32, -lim, lim)

    # Parameter shapes match the PyTorch module's __init__ (deterministic init).
    w1 = u(ks[0], (10, 1, 5, 5), 25);    b1 = u(ks[1], (10,), 25)
    w2 = u(ks[2], (20, 10, 5, 5), 250);  b2 = u(ks[3], (20,), 250)
    wf1 = u(ks[4], (50, 320), 320);      bf1 = u(ks[5], (50,), 320)
    wf2 = u(ks[6], (10, 50), 50);        bf2 = u(ks[7], (10,), 50)
    params = (w1, b1, w2, b2, wf1, bf1, wf2, bf2)

    # MNIST-style input implied by fc1(320): 28x28 single-channel.
    x = jax.random.normal(ks[8], (2, 1, 28, 28), jnp.float32)

    prep = prepare_params(params)
    out = jax.block_until_ready(follower_forward(x, prep))
    ref = jax.block_until_ready(_reference(x, params))
    # Kernel matmuls use bf16 operands with f32 accumulation; compare against
    # the f32 HIGHEST-precision reference at a matching tolerance.
    np.testing.assert_allclose(np.asarray(out), np.asarray(ref),
                               rtol=2e-2, atol=2e-2)
    assert out.shape == (2, 10)
    print("KERNEL_OK")
</pallas_src>

<mosaic_0001>
module attributes {stable_mosaic.version = 11 : i64} {
  func.func @_follower_kernel(%arg0: i32, %arg1: memref<2x28x128xf32, #tpu.memory_space<vmem>>, %arg2: memref<640x256xbf16, #tpu.memory_space<vmem>>, %arg3: memref<1x256xf32, #tpu.memory_space<vmem>>, %arg4: memref<640x256xbf16, #tpu.memory_space<vmem>>, %arg5: memref<1x256xf32, #tpu.memory_space<vmem>>, %arg6: memref<4x128x50xbf16, #tpu.memory_space<vmem>>, %arg7: memref<1x50xf32, #tpu.memory_space<vmem>>, %arg8: memref<50x10xbf16, #tpu.memory_space<vmem>>, %arg9: memref<1x10xf32, #tpu.memory_space<vmem>>, %arg10: memref<2x1x10xf32, #tpu.memory_space<vmem>>) attributes {dimension_semantics = [#tpu.dimension_semantics<parallel>], iteration_bounds = array<i64: 1>, scalar_prefetch = 0 : i64, scratch_operands = 0 : i64, tpu.core_type = #tpu.core_type<tc>, window_params = [{transform_indices = @transform_0, window_bounds = array<i64: 2, 28, 128>}, {pipeline_mode = #tpu.pipeline_mode<synchronous>, transform_indices = @transform_1, window_bounds = array<i64: 640, 256>}, {pipeline_mode = #tpu.pipeline_mode<synchronous>, transform_indices = @transform_2, window_bounds = array<i64: 1, 256>}, {pipeline_mode = #tpu.pipeline_mode<synchronous>, transform_indices = @transform_3, window_bounds = array<i64: 640, 256>}, {pipeline_mode = #tpu.pipeline_mode<synchronous>, transform_indices = @transform_4, window_bounds = array<i64: 1, 256>}, {pipeline_mode = #tpu.pipeline_mode<synchronous>, transform_indices = @transform_5, window_bounds = array<i64: 4, 128, 50>}, {pipeline_mode = #tpu.pipeline_mode<synchronous>, transform_indices = @transform_6, window_bounds = array<i64: 1, 50>}, {pipeline_mode = #tpu.pipeline_mode<synchronous>, transform_indices = @transform_7, window_bounds = array<i64: 50, 10>}, {pipeline_mode = #tpu.pipeline_mode<synchronous>, transform_indices = @transform_8, window_bounds = array<i64: 1, 10>}, {transform_indices = @transform_9, window_bounds = array<i64: 2, 1, 10>}]} {
    %c0 = arith.constant 0 : index
    %c0_0 = arith.constant 0 : index
    %c0_1 = arith.constant 0 : index
    %0 = vector.load %arg1[%c0, %c0_0, %c0_1] : memref<2x28x128xf32, #tpu.memory_space<vmem>>, vector<2x28x128xf32>
    %1 = vector.extract_strided_slice %0 {offsets = [0, 0, 0], sizes = [2, 24, 128], strides = [1, 1, 1]} : vector<2x28x128xf32> to vector<2x24x128xf32>
    %2 = vector.extract_strided_slice %0 {offsets = [0, 1, 0], sizes = [2, 24, 128], strides = [1, 1, 1]} : vector<2x28x128xf32> to vector<2x24x128xf32>
    %3 = vector.extract_strided_slice %0 {offsets = [0, 2, 0], sizes = [2, 24, 128], strides = [1, 1, 1]} : vector<2x28x128xf32> to vector<2x24x128xf32>
    %4 = vector.extract_strided_slice %0 {offsets = [0, 3, 0], sizes = [2, 24, 128], strides = [1, 1, 1]} : vector<2x28x128xf32> to vector<2x24x128xf32>
    %5 = vector.extract_strided_slice %0 {offsets = [0, 4, 0], sizes = [2, 24, 128], strides = [1, 1, 1]} : vector<2x28x128xf32> to vector<2x24x128xf32>
    %6 = tpu.concatenate %1, %2, %3, %4, %5 in 2 : vector<2x24x128xf32>, vector<2x24x128xf32>, vector<2x24x128xf32>, vector<2x24x128xf32>, vector<2x24x128xf32> -> vector<2x24x640xf32>
    %7 = vector.shape_cast %6 : vector<2x24x640xf32> to vector<48x640xf32>
    %8 = arith.truncf %7 : vector<48x640xf32> to vector<48x640xbf16>
    %c0_2 = arith.constant 0 : index
    %c0_3 = arith.constant 0 : index
    %9 = vector.load %arg2[%c0_2, %c0_3] : memref<640x256xbf16, #tpu.memory_space<vmem>>, vector<640x256xbf16>
    %cst = arith.constant dense<0.000000e+00> : vector<48x256xf32>
    %10 = tpu.matmul %8, %9, %cst {dimension_numbers = #tpu.dot_dimension_numbers<[1], [0], [0], [1], [0, 0, 1, 1], [], []>} : vector<48x640xbf16>, vector<640x256xbf16>, vector<48x256xf32> -> vector<48x256xf32>
    %c0_4 = arith.constant 0 : index
    %c0_5 = arith.constant 0 : index
    %11 = vector.load %arg3[%c0_4, %c0_5] : memref<1x256xf32, #tpu.memory_space<vmem>>, vector<1x256xf32>
    %12 = vector.broadcast %11 : vector<1x256xf32> to vector<48x256xf32>
    %13 = arith.addf %10, %12 : vector<48x256xf32>
    %14 = vector.shape_cast %13 : vector<48x256xf32> to vector<2x24x256xf32>
    %15 = vector.extract_strided_slice %14 {offsets = [0, 0, 0], sizes = [2, 24, 128], strides = [1, 1, 1]} : vector<2x24x256xf32> to vector<2x24x128xf32>
    %16 = vector.extract_strided_slice %14 {offsets = [0, 0, 128], sizes = [2, 24, 128], strides = [1, 1, 1]} : vector<2x24x256xf32> to vector<2x24x128xf32>
    %17 = arith.maximumf %15, %16 : vector<2x24x128xf32>
    %18 = vector.shape_cast %17 : vector<2x24x128xf32> to vector<2x12x2x128xf32>
    %19 = vector.extract_strided_slice %18 {offsets = [0, 0, 0, 0], sizes = [2, 12, 1, 128], strides = [1, 1, 1, 1]} : vector<2x12x2x128xf32> to vector<2x12x1x128xf32>
    %20 = vector.shape_cast %19 : vector<2x12x1x128xf32> to vector<2x12x128xf32>
    %21 = vector.extract_strided_slice %18 {offsets = [0, 0, 1, 0], sizes = [2, 12, 1, 128], strides = [1, 1, 1, 1]} : vector<2x12x2x128xf32> to vector<2x12x1x128xf32>
    %22 = vector.shape_cast %21 : vector<2x12x1x128xf32> to vector<2x12x128xf32>
    %23 = arith.maximumf %20, %22 : vector<2x12x128xf32>
    %cst_6 = arith.constant 0.000000e+00 : f32
    %24 = vector.broadcast %cst_6 : f32 to vector<2x12x128xf32>
    %25 = arith.maximumf %23, %24 : vector<2x12x128xf32>
    %26 = vector.extract_strided_slice %25 {offsets = [0, 0, 0], sizes = [2, 8, 128], strides = [1, 1, 1]} : vector<2x12x128xf32> to vector<2x8x128xf32>
    %27 = vector.extract_strided_slice %25 {offsets = [0, 1, 0], sizes = [2, 8, 128], strides = [1, 1, 1]} : vector<2x12x128xf32> to vector<2x8x128xf32>
    %28 = vector.extract_strided_slice %25 {offsets = [0, 2, 0], sizes = [2, 8, 128], strides = [1, 1, 1]} : vector<2x12x128xf32> to vector<2x8x128xf32>
    %29 = vector.extract_strided_slice %25 {offsets = [0, 3, 0], sizes = [2, 8, 128], strides = [1, 1, 1]} : vector<2x12x128xf32> to vector<2x8x128xf32>
    %30 = vector.extract_strided_slice %25 {offsets = [0, 4, 0], sizes = [2, 8, 128], strides = [1, 1, 1]} : vector<2x12x128xf32> to vector<2x8x128xf32>
    %31 = tpu.concatenate %26, %27, %28, %29, %30 in 2 : vector<2x8x128xf32>, vector<2x8x128xf32>, vector<2x8x128xf32>, vector<2x8x128xf32>, vector<2x8x128xf32> -> vector<2x8x640xf32>
    %32 = vector.shape_cast %31 : vector<2x8x640xf32> to vector<16x640xf32>
    %33 = arith.truncf %32 : vector<16x640xf32> to vector<16x640xbf16>
    %c0_7 = arith.constant 0 : index
    %c0_8 = arith.constant 0 : index
    %34 = vector.load %arg4[%c0_7, %c0_8] : memref<640x256xbf16, #tpu.memory_space<vmem>>, vector<640x256xbf16>
    %cst_9 = arith.constant dense<0.000000e+00> : vector<16x256xf32>
    %35 = tpu.matmul %33, %34, %cst_9 {dimension_numbers = #tpu.dot_dimension_numbers<[1], [0], [0], [1], [0, 0, 1, 1], [], []>} : vector<16x640xbf16>, vector<640x256xbf16>, vector<16x256xf32> -> vector<16x256xf32>
    %c0_10 = arith.constant 0 : index
    %c0_11 = arith.constant 0 : index
    %36 = vector.load %arg5[%c0_10, %c0_11] : memref<1x256xf32, #tpu.memory_space<vmem>>, vector<1x256xf32>
    %37 = vector.broadcast %36 : vector<1x256xf32> to vector<16x256xf32>
    %38 = arith.addf %35, %37 : vector<16x256xf32>
    %39 = vector.shape_cast %38 : vector<16x256xf32> to vector<2x8x256xf32>
    %40 = vector.extract_strided_slice %39 {offsets = [0, 0, 0], sizes = [2, 8, 128], strides = [1, 1, 1]} : vector<2x8x256xf32> to vector<2x8x128xf32>
    %41 = vector.extract_strided_slice %39 {offsets = [0, 0, 128], sizes = [2, 8, 128], strides = [1, 1, 1]} : vector<2x8x256xf32> to vector<2x8x128xf32>
    %42 = arith.maximumf %40, %41 : vector<2x8x128xf32>
    %43 = vector.shape_cast %42 : vector<2x8x128xf32> to vector<2x4x2x128xf32>
    %44 = vector.extract_strided_slice %43 {offsets = [0, 0, 0, 0], sizes = [2, 4, 1, 128], strides = [1, 1, 1, 1]} : vector<2x4x2x128xf32> to vector<2x4x1x128xf32>
    %45 = vector.shape_cast %44 : vector<2x4x1x128xf32> to vector<2x4x128xf32>
    %46 = vector.extract_strided_slice %43 {offsets = [0, 0, 1, 0], sizes = [2, 4, 1, 128], strides = [1, 1, 1, 1]} : vector<2x4x2x128xf32> to vector<2x4x1x128xf32>
    %47 = vector.shape_cast %46 : vector<2x4x1x128xf32> to vector<2x4x128xf32>
    %48 = arith.maximumf %45, %47 : vector<2x4x128xf32>
    %cst_12 = arith.constant 0.000000e+00 : f32
    %49 = vector.broadcast %cst_12 : f32 to vector<2x4x128xf32>
    %50 = arith.maximumf %48, %49 : vector<2x4x128xf32>
    %c0_13 = arith.constant 0 : index
    %c0_14 = arith.constant 0 : index
    %51 = vector.load %arg7[%c0_13, %c0_14] : memref<1x50xf32, #tpu.memory_space<vmem>>, vector<1x50xf32>
    %52 = vector.extract_strided_slice %50 {offsets = [0, 0, 0], sizes = [2, 1, 128], strides = [1, 1, 1]} : vector<2x4x128xf32> to vector<2x1x128xf32>
    %53 = vector.shape_cast %52 : vector<2x1x128xf32> to vector<2x128xf32>
    %54 = arith.truncf %53 : vector<2x128xf32> to vector<2x128xbf16>
    %c0_15 = arith.constant 0 : index
    %c0_16 = arith.constant 0 : index
    %c0_17 = arith.constant 0 : index
    %55 = vector.load %arg6[%c0_15, %c0_16, %c0_17] : memref<4x128x50xbf16, #tpu.memory_space<vmem>>, vector<1x128x50xbf16>
    %56 = vector.shape_cast %55 : vector<1x128x50xbf16> to vector<128x50xbf16>
    %cst_18 = arith.constant dense<0.000000e+00> : vector<2x50xf32>
    %57 = tpu.matmul %54, %56, %cst_18 {dimension_numbers = #tpu.dot_dimension_numbers<[1], [0], [0], [1], [0, 0, 1, 1], [], []>} : vector<2x128xbf16>, vector<128x50xbf16>, vector<2x50xf32> -> vector<2x50xf32>
    %58 = vector.broadcast %51 : vector<1x50xf32> to vector<2x50xf32>
    %59 = arith.addf %58, %57 : vector<2x50xf32>
    %60 = vector.extract_strided_slice %50 {offsets = [0, 1, 0], sizes = [2, 1, 128], strides = [1, 1, 1]} : vector<2x4x128xf32> to vector<2x1x128xf32>
    %61 = vector.shape_cast %60 : vector<2x1x128xf32> to vector<2x128xf32>
    %62 = arith.truncf %61 : vector<2x128xf32> to vector<2x128xbf16>
    %c1 = arith.constant 1 : index
    %c0_19 = arith.constant 0 : index
    %c0_20 = arith.constant 0 : index
    %63 = vector.load %arg6[%c1, %c0_19, %c0_20] : memref<4x128x50xbf16, #tpu.memory_space<vmem>>, vector<1x128x50xbf16>
    %64 = vector.shape_cast %63 : vector<1x128x50xbf16> to vector<128x50xbf16>
    %cst_21 = arith.constant dense<0.000000e+00> : vector<2x50xf32>
    %65 = tpu.matmul %62, %64, %cst_21 {dimension_numbers = #tpu.dot_dimension_numbers<[1], [0], [0], [1], [0, 0, 1, 1], [], []>} : vector<2x128xbf16>, vector<128x50xbf16>, vector<2x50xf32> -> vector<2x50xf32>
    %66 = arith.addf %59, %65 : vector<2x50xf32>
    %67 = vector.extract_strided_slice %50 {offsets = [0, 2, 0], sizes = [2, 1, 128], strides = [1, 1, 1]} : vector<2x4x128xf32> to vector<2x1x128xf32>
    %68 = vector.shape_cast %67 : vector<2x1x128xf32> to vector<2x128xf32>
    %69 = arith.truncf %68 : vector<2x128xf32> to vector<2x128xbf16>
    %c2 = arith.constant 2 : index
    %c0_22 = arith.constant 0 : index
    %c0_23 = arith.constant 0 : index
    %70 = vector.load %arg6[%c2, %c0_22, %c0_23] : memref<4x128x50xbf16, #tpu.memory_space<vmem>>, vector<1x128x50xbf16>
    %71 = vector.shape_cast %70 : vector<1x128x50xbf16> to vector<128x50xbf16>
    %cst_24 = arith.constant dense<0.000000e+00> : vector<2x50xf32>
    %72 = tpu.matmul %69, %71, %cst_24 {dimension_numbers = #tpu.dot_dimension_numbers<[1], [0], [0], [1], [0, 0, 1, 1], [], []>} : vector<2x128xbf16>, vector<128x50xbf16>, vector<2x50xf32> -> vector<2x50xf32>
    %73 = arith.addf %66, %72 : vector<2x50xf32>
    %74 = vector.extract_strided_slice %50 {offsets = [0, 3, 0], sizes = [2, 1, 128], strides = [1, 1, 1]} : vector<2x4x128xf32> to vector<2x1x128xf32>
    %75 = vector.shape_cast %74 : vector<2x1x128xf32> to vector<2x128xf32>
    %76 = arith.truncf %75 : vector<2x128xf32> to vector<2x128xbf16>
    %c3 = arith.constant 3 : index
    %c0_25 = arith.constant 0 : index
    %c0_26 = arith.constant 0 : index
    %77 = vector.load %arg6[%c3, %c0_25, %c0_26] : memref<4x128x50xbf16, #tpu.memory_space<vmem>>, vector<1x128x50xbf16>
    %78 = vector.shape_cast %77 : vector<1x128x50xbf16> to vector<128x50xbf16>
    %cst_27 = arith.constant dense<0.000000e+00> : vector<2x50xf32>
    %79 = tpu.matmul %76, %78, %cst_27 {dimension_numbers = #tpu.dot_dimension_numbers<[1], [0], [0], [1], [0, 0, 1, 1], [], []>} : vector<2x128xbf16>, vector<128x50xbf16>, vector<2x50xf32> -> vector<2x50xf32>
    %80 = arith.addf %73, %79 : vector<2x50xf32>
    %cst_28 = arith.constant 0.000000e+00 : f32
    %81 = vector.broadcast %cst_28 : f32 to vector<2x50xf32>
    %82 = arith.maximumf %80, %81 : vector<2x50xf32>
    %83 = arith.truncf %82 : vector<2x50xf32> to vector<2x50xbf16>
    %c0_29 = arith.constant 0 : index
    %c0_30 = arith.constant 0 : index
    %84 = vector.load %arg8[%c0_29, %c0_30] : memref<50x10xbf16, #tpu.memory_space<vmem>>, vector<50x10xbf16>
    %cst_31 = arith.constant dense<0.000000e+00> : vector<2x10xf32>
    %85 = tpu.matmul %83, %84, %cst_31 {dimension_numbers = #tpu.dot_dimension_numbers<[1], [0], [0], [1], [0, 0, 1, 1], [], []>} : vector<2x50xbf16>, vector<50x10xbf16>, vector<2x10xf32> -> vector<2x10xf32>
    %c0_32 = arith.constant 0 : index
    %c0_33 = arith.constant 0 : index
    %86 = vector.load %arg9[%c0_32, %c0_33] : memref<1x10xf32, #tpu.memory_space<vmem>>, vector<1x10xf32>
    %87 = vector.broadcast %86 : vector<1x10xf32> to vector<2x10xf32>
    %88 = arith.addf %85, %87 : vector<2x10xf32>
    %c0_34 = arith.constant 0 : index
    %c0_35 = arith.constant 0 : index
    %c0_36 = arith.constant 0 : index
    %89 = vector.load %arg10[%c0_34, %c0_35, %c0_36] : memref<2x1x10xf32, #tpu.memory_space<vmem>>, vector<2x1x10xf32>
    %90 = vector.shape_cast %89 : vector<2x1x10xf32> to vector<2x10xf32>
    %91 = vector.shape_cast %88 : vector<2x10xf32> to vector<2x1x10xf32>
    tpu.vector_store %arg10[%c0_34, %c0_35, %c0_36], %91 {strides = array<i32>} : memref<2x1x10xf32, #tpu.memory_space<vmem>>, vector<2x1x10xf32>,
    return
  }
  func.func @transform_0(%arg0: i32) -> (i32, i32, i32) {
    %c0_i32 = arith.constant 0 : i32
    %c0_i32_0 = arith.constant 0 : i32
    %c0_i32_1 = arith.constant 0 : i32
    return %arg0, %c0_i32, %c0_i32_0 : i32, i32, i32
  }
  func.func @transform_1(%arg0: i32) -> (i32, i32) {
    %c0_i32 = arith.constant 0 : i32
    %c0_i32_0 = arith.constant 0 : i32
    %c0_i32_1 = arith.constant 0 : i32
    return %c0_i32, %c0_i32_0 : i32, i32
  }
  func.func @transform_2(%arg0: i32) -> (i32, i32) {
    %c0_i32 = arith.constant 0 : i32
    %c0_i32_0 = arith.constant 0 : i32
    %c0_i32_1 = arith.constant 0 : i32
    return %c0_i32, %c0_i32_0 : i32, i32
  }
  func.func @transform_3(%arg0: i32) -> (i32, i32) {
    %c0_i32 = arith.constant 0 : i32
    %c0_i32_0 = arith.constant 0 : i32
    %c0_i32_1 = arith.constant 0 : i32
    return %c0_i32, %c0_i32_0 : i32, i32
  }
  func.func @transform_4(%arg0: i32) -> (i32, i32) {
    %c0_i32 = arith.constant 0 : i32
    %c0_i32_0 = arith.constant 0 : i32
    %c0_i32_1 = arith.constant 0 : i32
    return %c0_i32, %c0_i32_0 : i32, i32
  }
  func.func @transform_5(%arg0: i32) -> (i32, i32, i32) {
    %c0_i32 = arith.constant 0 : i32
    %c0_i32_0 = arith.constant 0 : i32
    %c0_i32_1 = arith.constant 0 : i32
    %c0_i32_2 = arith.constant 0 : i32
    return %c0_i32, %c0_i32_0, %c0_i32_1 : i32, i32, i32
  }
  func.func @transform_6(%arg0: i32) -> (i32, i32) {
    %c0_i32 = arith.constant 0 : i32
    %c0_i32_0 = arith.constant 0 : i32
    %c0_i32_1 = arith.constant 0 : i32
    return %c0_i32, %c0_i32_0 : i32, i32
  }
  func.func @transform_7(%arg0: i32) -> (i32, i32) {
    %c0_i32 = arith.constant 0 : i32
    %c0_i32_0 = arith.constant 0 : i32
    %c0_i32_1 = arith.constant 0 : i32
    return %c0_i32, %c0_i32_0 : i32, i32
  }
  func.func @transform_8(%arg0: i32) -> (i32, i32) {
    %c0_i32 = arith.constant 0 : i32
    %c0_i32_0 = arith.constant 0 : i32
    %c0_i32_1 = arith.constant 0 : i32
    return %c0_i32, %c0_i32_0 : i32, i32
  }
  func.func @transform_9(%arg0: i32) -> (i32, i32, i32) {
    %c0_i32 = arith.constant 0 : i32
    %c0_i32_0 = arith.constant 0 : i32
    %c0_i32_1 = arith.constant 0 : i32
    return %arg0, %c0_i32, %c0_i32_0 : i32, i32, i32
  }
}

</mosaic_0001>

<bundles_post_ra>
// kernel: tpu_custom_call.1
= control target key start
LH: loop header
LB: loop body
LE: loop exit
PB: predicated region body
PF: predicated region fallthrough
CT: control target
= control target key end

     0   :  { %14 = vsyncpa [#allocation3], 0  ;;  %s4133_s0 = inlined_call_operand.vmem [shape: f32[2,28,128], index: 0, kind: input, shape index: {}]   ;;  %s4134_s1 = inlined_call_operand.hbm [shape: bf16[640,256], index: 1, kind: input, shape index: {}]   ;;  %s4135_s2 = inlined_call_operand.vmem [shape: f32[1,256], index: 2, kind: input, shape index: {}]   ;;  %s4136_s3 = inlined_call_operand.hbm [shape: bf16[640,256], index: 3, kind: input, shape index: {}]   ;;  %s4137_s4 = inlined_call_operand.vmem [shape: f32[1,256], index: 4, kind: input, shape index: {}]   ;;  %s4138_s5 = inlined_call_operand.vmem [shape: bf16[4,128,50], index: 5, kind: input, shape index: {}]   ;;  %s4139_s6 = inlined_call_operand.vmem [shape: f32[1,50], index: 6, kind: input, shape index: {}]   ;;  %s4140_s7 = inlined_call_operand.vmem [shape: bf16[50,10], index: 7, kind: input, shape index: {}]   ;;  %s4141_s8 = inlined_call_operand.vmem [shape: f32[1,10], index: 8, kind: input, shape index: {}]   ;;  %s4142_s9 = inlined_call_operand.hbm [shape: f32[2,1,10], index: 9, kind: output, shape index: {}]  }
   0x1   :  { %15 = vsyncpa [#allocation6], 0 }
   0x2   :  { %16 = vsyncpa [#allocation4], 0  ;;  %s3469_s30 = smov [#allocation2]   ;;  %s3397_s13 = scalar_lea.hbm %s4134_s1, 10240 }
   0x3   :  { %s24_s10 = sshll.u32 %s3469_s30, 4  ;;  %p3398_p0 = scmp.ne.s32.totalorder %s4134_s1, %s3397_s13  ;;  %s25_s10 = int_to_ptr.vmem [resolvable:$true] %s24_s10 }
   0x4   :  { %p3401_p1 = scmp.lt.u32.totalorder %s3397_s13, %s4134_s1 }
   0x6   :  { %p3403_p2 = pnand %p3401_p1, %p3398_p0 }
   0x8   :  { %3406 = shalt.err (!%p3403_p2)
}
   0x9   :  { %s3407_s18 = scalar_lea.vmem %s25_s10, 10240  ;;  %p3412_p4 = scmp.lt.s32.totalorder %s25_s10, %s25_s10 }
   0xa   :  { %p3408_p3 = scmp.ne.s32.totalorder %s25_s10, %s3407_s18  ;;  %p3413_p5 = scmp.lt.s32.totalorder %s3407_s18, %s3407_s18 }
   0xc   :  { %p3414_p6 = por %p3413_p5, %p3412_p4 }
   0xe   :  { %p3415_p7 = pnand %p3414_p6, %p3408_p3 }
  0x10   :  { %3418 = shalt.err (!%p3415_p7)
}
  0x11   :  { %s3470_s19 = smov 128   ;;  %s3471_s20 = smov 8  }
  0x12   :  { %30 = dma.hbm_to_vmem [thread:$0]  %s4134_s1, 10240, %s25_s10, [#allocation3], %s3470_s19, %s3470_s19, %s3471_s20  }
  0x13   :  { %s3472_s23 = smov [#allocation5]   ;;  %s3419_s27 = scalar_lea.hbm %s4136_s3, 10240 }
  0x14   :  { %s38_s24 = sshll.u32 %s3472_s23, 4  ;;  %p3420_p8 = scmp.ne.s32.totalorder %s4136_s3, %s3419_s27  ;;  %s39_s24 = int_to_ptr.vmem [resolvable:$true] %s38_s24 }
  0x15   :  { %p3423_p9 = scmp.lt.u32.totalorder %s3419_s27, %s4136_s3 }
  0x17   :  { %p3425_p10 = pnand %p3423_p9, %p3420_p8 }
  0x19   :  { %3428 = shalt.err (!%p3425_p10)
}
  0x1a   :  { %s3429_s12 = scalar_lea.vmem %s39_s24, 10240  ;;  %p3434_p12 = scmp.lt.s32.totalorder %s39_s24, %s39_s24 }
  0x1b   :  { %p3430_p11 = scmp.ne.s32.totalorder %s39_s24, %s3429_s12  ;;  %p3435_p13 = scmp.lt.s32.totalorder %s3429_s12, %s3429_s12 }
  0x1d   :  { %p3436_p0 = por %p3435_p13, %p3434_p12 }
  0x1f   :  { %p3437_p1 = pnand %p3436_p0, %p3430_p11 }
  0x21   :  { %3440 = shalt.err (!%p3437_p1)
}
  0x22   :  { %44 = dma.hbm_to_vmem [thread:$0]  %s4136_s3, 10240, %s39_s24, [#allocation6], %s3470_s19, %s3470_s19, %s3471_s20  }
  0x23   :  { %3463 = dma.done.wait [#allocation3], 10240  }
  0x24   :  { %3464 = vsyncadd [#allocation3], 4294957056 }
  0x25   :  { %3465 = dma.done.wait [#allocation6], 10240  }
  0x26   :  { %3466 = vsyncadd [#allocation6], 4294957056  ;;  %v3121_v0 = vld [vmem:[#allocation2 + $0x104] ss:$8 sps:$4 sm:$0xff]   ;;  %v3123_v1 = vld [vmem:[#allocation2 + $0x100] ss:$8 sps:$4 sm:$0xff]  }
  0x27   :  { %732 = vmatprep.subr.bf16.mxu0 %v3121_v0  ;;  %v3124_v2 = vld [vmem:[#allocation2 + $0x114] ss:$8 sps:$4 sm:$0xff]   ;;  %v3126_v3 = vld [vmem:[#allocation2 + $0x110] ss:$8 sps:$4 sm:$0xff]   ;;  %v3127_v4 = vld [vmem:[#allocation2 + $0x124] ss:$8 sps:$4 sm:$0xff]  }
  0x28   :  { %733 = vmatpush1.bf16.msra.mxu0 %v3123_v1  ;;  %v3129_v5 = vld [vmem:[#allocation2 + $0x120] ss:$8 sps:$4 sm:$0xff]   ;;  %v3130_v6 = vld [vmem:[#allocation2 + $0x134] ss:$8 sps:$4 sm:$0xff]   ;;  %v3142_v7 = vld [vmem:[#allocation2 + $0x4] ss:$8 sps:$4 sm:$0xff]  }
  0x29   :  { %734 = vmatprep.subr.bf16.mxu0 %v3124_v2  ;;  %v3144_v8 = vld [vmem:[#allocation2] ss:$8 sps:$4 sm:$0xff]   ;;  %v3132_v9 = vld [vmem:[#allocation2 + $0x130] ss:$8 sps:$4 sm:$0xff]   ;;  %v3133_v10 = vld [vmem:[#allocation2 + $0x144] ss:$8 sps:$4 sm:$0xff]   ;;  %669 = vmatprep.subr.bf16.mxu1 %v3142_v7 }
  0x2a   :  { %v3148_v11 = vld [vmem:[#allocation2 + $0x14] ss:$8 sps:$4 sm:$0xff]   ;;  %670 = vmatpush1.bf16.msra.mxu1 %v3144_v8  ;;  %v3150_v12 = vld [vmem:[#allocation2 + $0x10] ss:$8 sps:$4 sm:$0xff]   ;;  %v3135_v13 = vld [vmem:[#allocation2 + $0x140] ss:$8 sps:$4 sm:$0xff]  }
  0x2b   :  { %671 = vmatprep.subr.bf16.mxu1 %v3148_v11  ;;  %v3154_v14 = vld [vmem:[#allocation2 + $0x24] ss:$8 sps:$4 sm:$0xff]   ;;  %v3136_v15 = vld [vmem:[#allocation2 + $0x154] ss:$8 sps:$4 sm:$0xff]   ;;  %v3156_v16 = vld [vmem:[#allocation2 + $0x20] ss:$8 sps:$4 sm:$0xff]  }
  0x2c   :  { %735 = vmatpush1.bf16.msra.mxu0 %v3126_v3  ;;  %v3160_v17 = vld [vmem:[#allocation2 + $0x34] ss:$8 sps:$4 sm:$0xff]   ;;  %v3138_v18 = vld [vmem:[#allocation2 + $0x150] ss:$8 sps:$4 sm:$0xff]   ;;  %v3139_v19 = vld [vmem:[#allocation2 + $0x164] ss:$8 sps:$4 sm:$0xff]  }
  0x2d   :  { %736 = vmatprep.subr.bf16.mxu0 %v3127_v4  ;;  %v3162_v20 = vld [vmem:[#allocation2 + $0x30] ss:$8 sps:$4 sm:$0xff]   ;;  %v3166_v21 = vld [vmem:[#allocation2 + $0x44] ss:$8 sps:$4 sm:$0xff]   ;;  %v3141_v22 = vld [vmem:[#allocation2 + $0x160] ss:$8 sps:$4 sm:$0xff]  }
  0x2e   :  { %672 = vmatpush1.bf16.msra.mxu1 %v3150_v12  ;;  %v3145_v23 = vld [vmem:[#allocation2 + $0x174] ss:$8 sps:$4 sm:$0xff]   ;;  %v3168_v24 = vld [vmem:[#allocation2 + $0x40] ss:$8 sps:$4 sm:$0xff]   ;;  %v3147_v26 = vld [vmem:[#allocation2 + $0x170] ss:$8 sps:$4 sm:$0xff]  }
  0x2f   :  { %673 = vmatprep.subr.bf16.mxu1 %v3154_v14  ;;  %v3172_v25 = vld [vmem:[#allocation2 + $0x54] ss:$8 sps:$4 sm:$0xff]   ;;  %v3151_v27 = vld [vmem:[#allocation2 + $0x184] ss:$8 sps:$4 sm:$0xff]   ;;  %v3174_v28 = vld [vmem:[#allocation2 + $0x50] ss:$8 sps:$4 sm:$0xff]  }
  0x30   :  { %737 = vmatpush1.bf16.msra.mxu0 %v3129_v5  ;;  %v3178_v29 = vld [vmem:[#allocation2 + $0x64] ss:$8 sps:$4 sm:$0xff]   ;;  %v3153_v30 = vld [vmem:[#allocation2 + $0x180] ss:$8 sps:$4 sm:$0xff]   ;;  %v3157_v31 = vld [vmem:[#allocation2 + $0x194] ss:$8 sps:$4 sm:$0xff]  }
  0x31   :  { %738 = vmatprep.subr.bf16.mxu0 %v3130_v6  ;;  %v3180_v32 = vld [vmem:[#allocation2 + $0x60] ss:$8 sps:$4 sm:$0xff]   ;;  %v3159_v33 = vld [vmem:[#allocation2 + $0x190] ss:$8 sps:$4 sm:$0xff]   ;;  %v3184_v34 = vld [vmem:[#allocation2 + $0x74] ss:$8 sps:$4 sm:$0xff]  }
  0x32   :  { %674 = vmatpush1.bf16.msra.mxu1 %v3156_v16  ;;  %v3558_v35 = vld [vmem:[%s4133_s0] sm:$0xff]  ;;  %v3563_v36 = vld [vmem:[%s4133_s0 + $0x8] sm:$0xff]  ;;  %v3568_v37 = vld [vmem:[%s4133_s0 + $0x10] sm:$0xff]  ;;  %vm120_vm0 = vcmask 1044480   ;;  %vm78_vm1 = vcmask 1046528   ;;  %vm99_vm2 = vcmask 1045504  }
  0x33   :  { %675 = vmatprep.subr.bf16.mxu1 %v3160_v17  ;;  %v121_v38 = vrot.slane %v3558_v35, 3  ;;  %v79_v39 = vrot.slane %v3558_v35, 1  ;;  %v3163_v40 = vld [vmem:[#allocation2 + $0x1a4] ss:$8 sps:$4 sm:$0xff]   ;;  %v122_v41 = vrot.slane %v3563_v36, 3  ;;  %v124_v42 = vrot.slane %v3568_v37, 3 }
  0x34   :  { %739 = vmatpush1.bf16.msra.mxu0 %v3132_v9  ;;  %v3186_v43 = vld [vmem:[#allocation2 + $0x70] ss:$8 sps:$4 sm:$0xff]   ;;  %v80_v44 = vrot.slane %v3563_v36, 1  ;;  %v3190_v45 = vld [vmem:[#allocation2 + $0x84] ss:$8 sps:$4 sm:$0xff]   ;;  %v82_v48 = vrot.slane %v3568_v37, 1 }
  0x35   :  { %740 = vmatprep.subr.bf16.mxu0 %v3133_v10  ;;  %v123_v46 = vsel %vm120_vm0, %v121_v38, %v122_v41  ;;  %v125_v47 = vsel %vm120_vm0, %v122_v41, %v124_v42  ;;  %v3165_v49 = vld [vmem:[#allocation2 + $0x1a0] ss:$8 sps:$4 sm:$0xff]   ;;  %v3169_v52 = vld [vmem:[#allocation2 + $0x1b4] ss:$8 sps:$4 sm:$0xff]   ;;  %v3171_v57 = vld [vmem:[#allocation2 + $0x1b0] ss:$8 sps:$4 sm:$0xff]  }
  0x36   :  { %676 = vmatpush1.bf16.msra.mxu1 %v3162_v20  ;;  %v165_v50 = vpack.c.bf16 %v125_v47, %v123_v46  ;;  %v81_v51 = vsel %vm78_vm1, %v79_v39, %v80_v44  ;;  %v83_v53 = vsel %vm78_vm1, %v80_v44, %v82_v48  ;;  %v3192_v54 = vld [vmem:[#allocation2 + $0x80] ss:$8 sps:$4 sm:$0xff]   ;;  %v3196_v56 = vld [vmem:[#allocation2 + $0x94] ss:$8 sps:$4 sm:$0xff]   ;;  %v3175_v58 = vld [vmem:[#allocation2 + $0x1c4] ss:$8 sps:$4 sm:$0xff]  }
  0x37   :  { %677 = vmatprep.subr.bf16.mxu1 %v3166_v21  ;;  %v163_v55 = vpack.c.bf16 %v83_v53, %v81_v51  ;;  %v3198_v59 = vld [vmem:[#allocation2 + $0x90] ss:$8 sps:$4 sm:$0xff]   ;;  %v3202_v60 = vld [vmem:[#allocation2 + $0xa4] ss:$8 sps:$4 sm:$0xff]   ;;  %v3177_v61 = vld [vmem:[#allocation2 + $0x1c0] ss:$8 sps:$4 sm:$0xff]  }
  0x38   :  { %741 = vmatpush1.bf16.msra.mxu0 %v3135_v13  ;;  %764 = vmatprep.mubr.bf16.mxu0 %v165_v50  ;;  %v3181_v62 = vld [vmem:[#allocation2 + $0x1d4] ss:$8 sps:$4 sm:$0xff]   ;;  %v3204_v63 = vld [vmem:[#allocation2 + $0xa0] ss:$8 sps:$4 sm:$0xff]   ;;  %v3183_v1 = vld [vmem:[#allocation2 + $0x1d0] ss:$8 sps:$4 sm:$0xff]  }
  0x39   :  { %742 = vmatprep.subr.bf16.mxu0 %v3136_v15  ;;  %701 = vmatprep.mubr.bf16.mxu1 %v163_v55  ;;  %v3208_v0 = vld [vmem:[#allocation2 + $0xb4] ss:$8 sps:$4 sm:$0xff]   ;;  %v3187_v2 = vld [vmem:[#allocation2 + $0x1e4] ss:$8 sps:$4 sm:$0xff]   ;;  %v3210_v3 = vld [vmem:[#allocation2 + $0xb0] ss:$8 sps:$4 sm:$0xff]  }
  0x3a   :  { %678 = vmatpush1.bf16.msra.mxu1 %v3168_v24  ;;  %v3587_v4 = vld [vmem:[%s4133_s0 + $0x18] sm:$0xf]  ;;  %v3592_v5 = vld [vmem:[%s4133_s0 + $0x20] sm:$0xff]  ;;  %v3597_v6 = vld [vmem:[%s4133_s0 + $0x28] sm:$0xff]  ;;  %v100_v9 = vrot.slane %v3558_v35, 2  ;;  %v101_v10 = vrot.slane %v3563_v36, 2 }
  0x3b   :  { %679 = vmatprep.subr.bf16.mxu1 %v3172_v25  ;;  %v3214_v7 = vld [vmem:[#allocation2 + $0xc4] ss:$8 sps:$4 sm:$0xff]   ;;  %v3189_v8 = vld [vmem:[#allocation2 + $0x1e0] ss:$8 sps:$4 sm:$0xff]   ;;  %v103_v11 = vrot.slane %v3568_v37, 2  ;;  %v126_v13 = vrot.slane %v3587_v4, 3 }
  0x3c   :  { %743 = vmatpush1.bf16.msra.mxu0 %v3138_v18  ;;  %v3193_v12 = vld [vmem:[#allocation2 + $0x1f4] ss:$8 sps:$4 sm:$0xff]   ;;  %v128_v14 = vrot.slane %v3592_v5, 3  ;;  %v129_v15 = vrot.slane %v3597_v6, 3  ;;  %v3216_v16 = vld [vmem:[#allocation2 + $0xc0] ss:$8 sps:$4 sm:$0xff]   ;;  %v102_v20 = vsel %vm99_vm2, %v100_v9, %v101_v10 }
  0x3d   :  { %744 = vmatprep.subr.bf16.mxu0 %v3139_v19  ;;  %v3195_v17 = vld [vmem:[#allocation2 + $0x1f0] ss:$8 sps:$4 sm:$0xff]   ;;  %v3220_v18 = vld [vmem:[#allocation2 + $0xd4] ss:$8 sps:$4 sm:$0xff]   ;;  %v3201_v19 = vld [vmem:[#allocation2 + $0x204] ss:$8 sps:$4 sm:$0xff]   ;;  %v104_v21 = vsel %vm99_vm2, %v101_v10, %v103_v11 }
  0x3e   :  { %680 = vmatpush1.bf16.msra.mxu1 %v3174_v28  ;;  %v130_v24 = vsel %vm120_vm0, %v128_v14, %v129_v15  ;;  %v3614_v25 = vld [vmem:[%s4133_s0 + $0x30] sm:$0xff]  ;;  %v164_v28 = vpack.c.bf16 %v104_v21, %v102_v20  ;;  %v3228_v38 = vld [vmem:[#allocation2 + $0xe0] ss:$8 sps:$4 sm:$0xff]   ;;  %v84_v44 = vrot.slane %v3587_v4, 1  ;;  %v87_v46 = vrot.slane %v3597_v6, 1 }
  0x3f   :  { %681 = vmatprep.subr.bf16.mxu1 %v3178_v29  ;;  %v3207_v29 = vld [vmem:[#allocation2 + $0x214] ss:$8 sps:$4 sm:$0xff]   ;;  %v3234_v50 = vld [vmem:[#allocation2 + $0xf0] ss:$8 sps:$4 sm:$0xff]   ;;  %v3243_v53 = vld [vmem:[#allocation5 + $0x4] ss:$8 sps:$4 sm:$0xff]  }
  0x40   :  { %745 = vmatpush1.bf16.msra.mxu0 %v3141_v22  ;;  %v3222_v22 = vld [vmem:[#allocation2 + $0xd0] ss:$8 sps:$4 sm:$0xff]   ;;  %v3232_v39 = vld [vmem:[#allocation2 + $0xf4] ss:$8 sps:$4 sm:$0xff]   ;;  %vm141_vm3 = vcmask 1043456   ;;  %vm1196_vm4 = vcmask 1041409  }
  0x41   :  { %746 = vmatprep.subr.bf16.mxu0 %v3145_v23  ;;  %v127_v23 = vsel %vm120_vm0, %v124_v42, %v126_v13  ;;  %v3205_v42 = vld [vmem:[#allocation2 + $0x210] ss:$8 sps:$4 sm:$0xff]   ;;  %v3219_v55 = vld [vmem:[#allocation2 + $0x234] ss:$8 sps:$4 sm:$0xff]   ;;  %vm1198_vm5 = vcmask 1042434   ;;  %vm1200_vm6 = vcmask 1043459  }
  0x42   :  { %682 = vmatpush1.bf16.msra.mxu1 %v3180_v32  ;;  %v105_v32 = vrot.slane %v3587_v4, 2  ;;  %v3244_v10 = vld [vmem:[#allocation5 + $0x10] ss:$8 sps:$4 sm:$0xff]   ;;  %v3231_v13 = vld [vmem:[#allocation2 + $0x254] ss:$8 sps:$4 sm:$0xff]   ;;  %vm1202_vm7 = vcmask 1044484  }
  0x43   :  { %683 = vmatprep.subr.bf16.mxu1 %v3184_v34  ;;  %v108_v34 = vrot.slane %v3597_v6, 2  ;;  %v3229_v20 = vld [vmem:[#allocation2 + $0x250] ss:$8 sps:$4 sm:$0xff]   ;;  %vm1204_vm8 = vcmask 1045509   ;;  %vm1206_vm9 = vcmask 1046534   ;;  %vm1208_vm10 = vcmask 1047559  }
  0x44   :  { %747 = vmatpush1.bf16.msra.mxu0 %v3147_v26  ;;  %v3199_v26 = vld [vmem:[#allocation2 + $0x200] ss:$8 sps:$4 sm:$0xff]   ;;  %v106_v47 = vsel %vm99_vm2, %v103_v11, %v105_v32  ;;  %v3249_v11 = vld [vmem:[#allocation5 + $0x24] ss:$8 sps:$4 sm:$0xff]   ;;  %v3240_v32 = vld [vmem:[#allocation2 + $0x274] ss:$8 sps:$4 sm:$0xff]  }
  0x45   :  { %748 = vmatprep.subr.bf16.mxu0 %v3151_v27  ;;  %v3619_v27 = vld [vmem:[%s4133_s0 + $0x38] sm:$0xf]  ;;  %vm3476_vm11 = vmmov 0   ;;  %vm2546_vm12 = vcmask 1040384   ;;  %vm2542_vm13 = vcmask 408576   ;;  %vm2615_vm14 = vcmask 73728  }
  0x46   :  { %684 = vmatpush1.bf16.msra.mxu1 %v3186_v43  ;;  %v133_v41 = vrot.slane %v3619_v27, 3  ;;  %v3213_v43 = vld [vmem:[#allocation2 + $0x224] ss:$8 sps:$4 sm:$0xff]  }
  0x47   :  { %685 = vmatprep.subr.bf16.mxu1 %v3190_v45  ;;  %v86_v45 = vrot.slane %v3592_v5, 1 }
  0x48   :  { %749 = vmatpush1.bf16.msra.mxu0 %v3153_v30  ;;  %v3226_v30 = vld [vmem:[#allocation2 + $0xe4] ss:$8 sps:$4 sm:$0xff]  }
  0x49   :  { %750 = vmatprep.subr.bf16.mxu0 %v3157_v31  ;;  %v170_v31 = vpack.c.bf16 %v130_v24, %v127_v23  ;;  %v3473_v23 = vmov 0   ;;  %v3250_v24 = vld [vmem:[#allocation5 + $0x30] ss:$8 sps:$4 sm:$0xff]  }
  0x4a   :  { %686 = vmatpush1.bf16.msra.mxu1 %v3192_v54  ;;  %v3211_v54 = vld [vmem:[#allocation2 + $0x220] ss:$8 sps:$4 sm:$0xff]  }
  0x4b   :  { %687 = vmatprep.subr.bf16.mxu1 %v3196_v56 }
  0x4c   :  { %751 = vmatpush1.bf16.msra.mxu0 %v3159_v33  ;;  %v107_v33 = vrot.slane %v3592_v5, 2 }
  0x4d   :  { %752 = vmatprep.subr.bf16.mxu0 %v3163_v40  ;;  %v131_v40 = vrot.slane %v3614_v25, 3 }
  0x4e   :  { %688 = vmatpush1.bf16.msra.mxu1 %v3198_v59 }
  0x4f   :  { %689 = vmatprep.subr.bf16.mxu1 %v3202_v60  ;;  %v132_v51 = vsel %vm120_vm0, %v129_v15, %v131_v40  ;;  %v110_v60 = vrot.slane %v3614_v25, 2 }
  0x50   :  { %753 = vmatpush1.bf16.msra.mxu0 %v3165_v49  ;;  %v109_v49 = vsel %vm99_vm2, %v107_v33, %v108_v34  ;;  %v147_v33 = vrot.slane %v3587_v4, 4 }
  0x51   :  { %754 = vmatprep.subr.bf16.mxu0 %v3169_v52  ;;  %v134_v52 = vsel %vm120_vm0, %v131_v40, %v133_v41  ;;  %v169_v56 = vpack.c.bf16 %v109_v49, %v106_v47  ;;  %v154_v40 = vrot.slane %v3619_v27, 4  ;;  %v3261_v47 = vld [vmem:[#allocation5 + $0x64] ss:$8 sps:$4 sm:$0xff]   ;;  %v3259_v49 = vld [vmem:[#allocation5 + $0x60] ss:$8 sps:$4 sm:$0xff]  }
  0x52   :  { %690 = vmatpush1.bf16.msra.mxu1 %v3204_v63  ;;  %v175_v59 = vpack.c.bf16 %v134_v52, %v132_v51  ;;  %v162_v63 = vpack.c.bf16 %v3563_v36, %v3558_v35  ;;  %v3262_v51 = vld [vmem:[#allocation5 + $0x70] ss:$8 sps:$4 sm:$0xff]   ;;  %v3267_v52 = vld [vmem:[#allocation5 + $0x84] ss:$8 sps:$4 sm:$0xff]  }
  0x53   :  { %691 = vmatprep.subr.bf16.mxu1 %v3208_v0  ;;  %v3246_v0 = vld [vmem:[#allocation5 + $0x14] ss:$8 sps:$4 sm:$0xff]  }
  0x54   :  { %755 = vmatpush1.bf16.msra.mxu0 %v3171_v57  ;;  %v85_v57 = vsel %vm78_vm1, %v82_v48, %v84_v44  ;;  %v89_v48 = vrot.slane %v3614_v25, 1 }
  0x55   :  { %756 = vmatprep.subr.bf16.mxu0 %v3175_v58  ;;  %v88_v58 = vsel %vm78_vm1, %v86_v45, %v87_v46  ;;  %v3256_v45 = vld [vmem:[#allocation5 + $0x50] ss:$8 sps:$4 sm:$0xff]  }
  0x56   :  { %692 = vmatpush1.bf16.msra.mxu1 %v3210_v3  ;;  %v3225_v3 = vld [vmem:[#allocation2 + $0x244] ss:$8 sps:$4 sm:$0xff]   ;;  %v90_v15 = vsel %vm78_vm1, %v87_v46, %v89_v48  ;;  %v3258_v46 = vld [vmem:[#allocation5 + $0x54] ss:$8 sps:$4 sm:$0xff]  }
  0x57   :  { %693 = vmatprep.subr.bf16.mxu1 %v3214_v7  ;;  %v91_v7 = vrot.slane %v3619_v27, 1 }
  0x58   :  { %757 = vmatpush1.bf16.msra.mxu0 %v3177_v61  ;;  %v112_v61 = vrot.slane %v3619_v27, 2 }
  0x59   :  { %758 = vmatprep.subr.bf16.mxu0 %v3181_v62  ;;  %v3241_v62 = vld [vmem:[#allocation5] ss:$8 sps:$4 sm:$0xff]  }
  0x5a   :  { %694 = vmatpush1.bf16.msra.mxu1 %v3216_v16  ;;  %v113_v9 = vsel %vm99_vm2, %v110_v60, %v112_v61  ;;  %v92_v16 = vsel %vm78_vm1, %v89_v48, %v91_v7  ;;  %v3277_v61 = vld [vmem:[#allocation5 + $0xc0] ss:$8 sps:$4 sm:$0xff]   ;;  %v3291_v48 = vld [vmem:[#allocation5 + $0x104] ss:$8 sps:$4 sm:$0xff]  }
  0x5b   :  { %695 = vmatprep.subr.bf16.mxu1 %v3220_v18  ;;  %v167_v18 = vpack.c.bf16 %v3592_v5, %v3568_v37  ;;  %v173_v21 = vpack.c.bf16 %v92_v16, %v90_v15 }
  0x5c   :  { %759 = vmatpush1.bf16.msra.mxu0 %v3183_v1  ;;  %v3217_v1 = vld [vmem:[#allocation2 + $0x230] ss:$8 sps:$4 sm:$0xff]  }
  0x5d   :  { %760 = vmatprep.subr.bf16.mxu0 %v3187_v2  ;;  %v168_v2 = vpack.c.bf16 %v88_v58, %v85_v57  ;;  %v3271_v57 = vld [vmem:[#allocation5 + $0xa0] ss:$8 sps:$4 sm:$0xff]   ;;  %v3276_v58 = vld [vmem:[#allocation5 + $0xb4] ss:$8 sps:$4 sm:$0xff]  }
  0x5e   :  { %696 = vmatpush1.bf16.msra.mxu1 %v3222_v22  ;;  %v3237_v22 = vld [vmem:[#allocation2 + $0x264] ss:$8 sps:$4 sm:$0xff]  }
  0x5f   :  { %697 = vmatprep.subr.bf16.mxu1 %v3226_v30  ;;  %v143_v30 = vrot.slane %v3563_v36, 4  ;;  %v172_v36 = vpack.c.bf16 %v3614_v25, %v3597_v6 }
  0x60   :  { %761 = vmatpush1.bf16.msra.mxu0 %v3189_v8  ;;  %v111_v8 = vsel %vm99_vm2, %v108_v34, %v110_v60  ;;  %v149_v34 = vrot.slane %v3592_v5, 4  ;;  %v3279_v60 = vld [vmem:[#allocation5 + $0xc4] ss:$8 sps:$4 sm:$0xff]  }
  0x61   :  { %762 = vmatprep.subr.bf16.mxu0 %v3193_v12  ;;  %v3223_v12 = vld [vmem:[#allocation2 + $0x240] ss:$8 sps:$4 sm:$0xff]   ;;  %v174_v14 = vpack.c.bf16 %v113_v9, %v111_v8 }
  0x62   :  { %698 = vmatpush1.bf16.msra.mxu1 %v3228_v38  ;;  %v150_v38 = vrot.slane %v3597_v6, 4 }
  0x63   :  { %699 = vmatprep.subr.bf16.mxu1 %v3232_v39  ;;  %v152_v39 = vrot.slane %v3614_v25, 4 }
  0x64   :  { %763 = vmatpush1.bf16.msra.mxu0 %v3195_v17  ;;  %v3247_v17 = vld [vmem:[#allocation5 + $0x20] ss:$8 sps:$4 sm:$0xff]   ;;  %v151_v6 = vsel %vm141_vm3, %v149_v34, %v150_v38 }
  0x65   :  { %795 = vmatprep.subr.bf16.mxu0 %v3201_v19  ;;  %v3252_v19 = vld [vmem:[#allocation5 + $0x34] ss:$8 sps:$4 sm:$0xff]  }
  0x66   :  { %700 = vmatpush1.bf16.msra.mxu1 %v3234_v50  ;;  %v3264_v50 = vld [vmem:[#allocation5 + $0x74] ss:$8 sps:$4 sm:$0xff]  }
  0x67   :  { %765 = vmatmul.mubr.bf16.vlgmr.msra.gmra.mrb[0].mxu0 %v164_v28  ;;  %1820 = vmatprep.subr.bf16.mxu1 %v3243_v53  ;;  %v3235_v28 = vld [vmem:[#allocation2 + $0x260] ss:$8 sps:$4 sm:$0xff]  }
  0x68   :  { %796 = vmatpush1.bf16.msra.mxu0 %v3199_v26  ;;  %774 = vmatprep.mubr.bf16.mxu0 %v170_v31  ;;  %v3255_v26 = vld [vmem:[#allocation5 + $0x44] ss:$8 sps:$4 sm:$0xff]   ;;  %v145_v31 = vrot.slane %v3568_v37, 4  ;;  %v3238_v37 = vld [vmem:[#allocation2 + $0x270] ss:$8 sps:$4 sm:$0xff]  }
  0x69   :  { %797 = vmatprep.subr.bf16.mxu0 %v3207_v29  ;;  %702 = vmatmul.mubr.bf16.vlgmr.msra.gmra.mrb[0].mxu1 %v162_v63  ;;  %v142_v29 = vrot.slane %v3558_v35, 4  ;;  %v3253_v35 = vld [vmem:[#allocation5 + $0x40] ss:$8 sps:$4 sm:$0xff]   ;;  %v3280_v63 = vld [vmem:[#allocation5 + $0xd0] ss:$8 sps:$4 sm:$0xff]  }
  0x6a   :  { %711 = vmatprep.mubr.bf16.mxu1 %v168_v2  ;;  %1821 = vmatpush1.bf16.msra.mxu1 %v3241_v62  ;;  %v146_v5 = vsel %vm141_vm3, %v143_v30, %v145_v31  ;;  %v148_v27 = vsel %vm141_vm3, %v145_v31, %v147_v33  ;;  %v3265_v53 = vld [vmem:[#allocation5 + $0x80] ss:$8 sps:$4 sm:$0xff]   ;;  %v3282_v62 = vld [vmem:[#allocation5 + $0xd4] ss:$8 sps:$4 sm:$0xff]  }
  0x6b   :  { %1822 = vmatprep.subr.bf16.mxu1 %v3246_v0  ;;  %v144_v4 = vsel %vm141_vm3, %v142_v29, %v143_v30  ;;  %v171_v25 = vpack.c.bf16 %v151_v6, %v148_v27  ;;  %v3285_v0 = vld [vmem:[#allocation5 + $0xe4] ss:$8 sps:$4 sm:$0xff]   ;;  %v3288_v2 = vld [vmem:[#allocation5 + $0xf4] ss:$8 sps:$4 sm:$0xff]  }
  0x6c   :  { %798 = vmatpush1.bf16.msra.mxu0 %v3205_v42  ;;  %v166_v41 = vpack.c.bf16 %v146_v5, %v144_v4  ;;  %v153_v42 = vsel %vm141_vm3, %v150_v38, %v152_v39 }
  0x6d   :  { %799 = vmatprep.subr.bf16.mxu0 %v3213_v43  ;;  %v155_v43 = vsel %vm141_vm3, %v152_v39, %v154_v40 }
  0x6e   :  { %1823 = vmatpush1.bf16.msra.mxu1 %v3244_v10  ;;  %v176_v44 = vpack.c.bf16 %v155_v43, %v153_v42  ;;  %v259_v10 = vlaneseq }
  0x6f   :  { %775 = vmatmul.mubr.bf16.gmra.mrb[4].mxu0 %v169_v56  ;;  %1824 = vmatprep.subr.bf16.mxu1 %v3249_v11  ;;  %v3273_v56 = vld [vmem:[#allocation5 + $0xa4] ss:$8 sps:$4 sm:$0xff]  }
  0x70   :  { %800 = vmatpush1.bf16.msra.mxu0 %v3211_v54  ;;  %784 = vmatprep.mubr.bf16.mxu0 %v175_v59  ;;  %v3270_v54 = vld [vmem:[#allocation5 + $0x94] ss:$8 sps:$4 sm:$0xff]   ;;  %v3274_v59 = vld [vmem:[#allocation5 + $0xb0] ss:$8 sps:$4 sm:$0xff]  }
  0x71   :  { %801 = vmatprep.subr.bf16.mxu0 %v3219_v55  ;;  %712 = vmatmul.mubr.bf16.gmra.mrb[4].mxu1 %v167_v18  ;;  %v3268_v55 = vld [vmem:[#allocation5 + $0x90] ss:$8 sps:$4 sm:$0xff]   ;;  %v257_v18 = vld [vmem:[%s4135_s2] sm:$0x3] }
  0x72   :  { %721 = vmatprep.mubr.bf16.mxu1 %v173_v21  ;;  %1825 = vmatpush1.bf16.msra.mxu1 %v3247_v17 }
  0x73   :  { %1826 = vmatprep.subr.bf16.mxu1 %v3252_v19 }
  0x74   :  { %802 = vmatpush1.bf16.msra.mxu0 %v3217_v1  ;;  %v3283_v1 = vld [vmem:[#allocation5 + $0xe0] ss:$8 sps:$4 sm:$0xff]  }
  0x75   :  { %803 = vmatprep.subr.bf16.mxu0 %v3225_v3  ;;  %v3286_v3 = vld [vmem:[#allocation5 + $0xf0] ss:$8 sps:$4 sm:$0xff]  }
  0x76   :  { %1827 = vmatpush1.bf16.msra.mxu1 %v3250_v24 }
  0x77   :  { %785 = vmatmul.mubr.bf16.gmra.mrb[8].mxu0 %v174_v14  ;;  %1828 = vmatprep.subr.bf16.mxu1 %v3255_v26 }
  0x78   :  { %804 = vmatpush1.bf16.msra.mxu0 %v3223_v12  ;;  %827 = vmatprep.mubr.bf16.mxu0 %v3473_v23  ;;  %v3668_v12 = vshrl.u32 %v259_v10, 7 }
  0x79   :  { %805 = vmatprep.subr.bf16.mxu0 %v3231_v13  ;;  %722 = vmatmul.mubr.bf16.gmra.mrb[8].mxu1 %v172_v36 }
  0x7a   :  { %1829 = vmatpush1.bf16.msra.mxu1 %v3253_v35  ;;  %v3671_v16 = vsub.s32 0, %v3668_v12  ;;  %v265_v19 = vsub.s32 1, %v3668_v12 }
  0x7b   :  { %1830 = vmatprep.subr.bf16.mxu1 %v3258_v46 }
  0x7c   :  { %806 = vmatpush1.bf16.msra.mxu0 %v3229_v20  ;;  %v262_v20 = vrot.slane %v257_v18, %v3671_v16  ;;  %v3680_v21 = vrot.slane %v257_v18, %v265_v19 }
  0x7d   :  { %807 = vmatprep.subr.bf16.mxu0 %v3237_v22  ;;  %v3474_v22 = vmov 1983009808  }
  0x7e   :  { %1831 = vmatpush1.bf16.msra.mxu1 %v3256_v45  ;;  %v872_v24 = vunpack.c.l.s4 %v3474_v22 }
  0x7f   :  { %1832 = vmatprep.subr.bf16.mxu1 %v3261_v47 }
  0x80   :  { %808 = vmatpush1.bf16.msra.mxu0 %v3235_v28  ;;  %v873_v33 = vunpack.c.0.s8 %v872_v24 }
  0x81   :  { %809 = vmatprep.subr.bf16.mxu0 %v3240_v32 }
  0x82   :  { %1833 = vmatpush1.bf16.msra.mxu1 %v3259_v49  ;;  %v3686_v35 = vsub.s32 %v873_v33, %v3668_v12 }
  0x83   :  { %1834 = vmatprep.subr.bf16.mxu1 %v3264_v50 }
  0x84   :  { %810 = vmatpush1.bf16.msra.mxu0 %v3238_v37 }
  0x86   :  { %1835 = vmatpush1.bf16.msra.mxu1 %v3262_v51 }
  0x87   :  { %828 = vmatmul.mubr.bf16.vlgmr.msra.gmra.mrb[0].mxu0 %v166_v41  ;;  %1836 = vmatprep.subr.bf16.mxu1 %v3267_v52 }
  0x88   :  { %837 = vmatprep.mubr.bf16.mxu0 %v3473_v23 }
  0x8a   :  { %1837 = vmatpush1.bf16.msra.mxu1 %v3265_v53 }
  0x8b   :  { %1838 = vmatprep.subr.bf16.mxu1 %v3270_v54 }
  0x8e   :  { %1839 = vmatpush1.bf16.msra.mxu1 %v3268_v55 }
  0x8f   :  { %838 = vmatmul.mubr.bf16.gmra.mrb[4].mxu0 %v171_v25  ;;  %1840 = vmatprep.subr.bf16.mxu1 %v3273_v56 }
  0x90   :  { %847 = vmatprep.mubr.bf16.mxu0 %v3473_v23 }
  0x92   :  { %1841 = vmatpush1.bf16.msra.mxu1 %v3271_v57 }
  0x93   :  { %1842 = vmatprep.subr.bf16.mxu1 %v3276_v58 }
  0x96   :  { %1843 = vmatpush1.bf16.msra.mxu1 %v3274_v59 }
  0x97   :  { %848 = vmatmul.mubr.bf16.gmra.mrb[8].mxu0 %v176_v44  ;;  %1844 = vmatprep.subr.bf16.mxu1 %v3279_v60 }
  0x9a   :  { %1845 = vmatpush1.bf16.msra.mxu1 %v3277_v61 }
  0x9b   :  { %1846 = vmatprep.subr.bf16.mxu1 %v3282_v62 }
  0x9e   :  { %1847 = vmatpush1.bf16.msra.mxu1 %v3280_v63 }
  0x9f   :  { %1848 = vmatprep.subr.bf16.mxu1 %v3285_v0 }
  0xa2   :  { %1849 = vmatpush1.bf16.msra.mxu1 %v3283_v1 }
  0xa3   :  { %1850 = vmatprep.subr.bf16.mxu1 %v3288_v2 }
  0xa6   :  { %1851 = vmatpush1.bf16.msra.mxu1 %v3286_v3 }
  0xa7   :  { %1863 = vmatprep.subr.bf16.mxu1 %v3291_v48 }
 0x13c   :  { %v703_v7 = vpop.f32.mrb[0].mxu1 }
 0x13d   :  { %v705_v8 = vpop.f32.mrb[1].mxu1  ;;  %v704_v30 = vadd.f32 %v703_v7, %v262_v20 }
 0x13e   :  { %v707_v9 = vpop.f32.mrb[2].mxu1  ;;  %v706_v32 = vadd.f32 %v705_v8, %v3680_v21 }
 0x13f   :  { %v709_v11 = vpop.f32.mrb[3].mxu1  ;;  %v708_v38 = vadd.f32 %v707_v9, %v262_v20 }
 0x140   :  { %v710_v36 = vadd.f32 %v709_v11, %v3680_v21 }
 0x144   :  { %v713_v13 = vpop.f32.mrb[4].mxu1 }
 0x145   :  { %v715_v14 = vpop.f32.mrb[5].mxu1  ;;  %v714_v25 = vadd.f32 %v713_v13, %v262_v20 }
 0x146   :  { %v717_v15 = vpop.f32.mrb[6].mxu1  ;;  %v716_v45 = vadd.f32 %v715_v14, %v3680_v21 }
 0x147   :  { %v719_v17 = vpop.f32.mrb[7].mxu1  ;;  %v3691_v46 = vadd.f32 %v717_v15, %v262_v20 }
 0x148   :  { %v3694_v47 = vadd.f32 %v719_v17, %v3680_v21 }
 0x14c   :  { %v723_v26 = vpop.f32.mrb[8].mxu1 }
 0x14d   :  { %v725_v28 = vpop.f32.mrb[9].mxu1  ;;  %v3696_v49 = vadd.f32 %v723_v26, %v262_v20 }
 0x14e   :  { %v727_v29 = vpop.f32.mrb[10].mxu1  ;;  %v726_v58 = vadd.f32 %v725_v28, %v3680_v21 }
 0x14f   :  { %v3682_v31 = vpop.f32.mrb[11].mxu1  ;;  %v728_v59 = vadd.f32 %v727_v29, %v262_v20 }
 0x15a   :  { %v829_v34 = vpop.f32.mrb[0].mxu0 }
 0x15b   :  { %v3049_v39 = vadd.f32 %v829_v34, %v704_v30  ;;  %v831_v40 = vpop.f32.mrb[1].mxu0 }
 0x15c   :  { %v3051_v37 = vadd.f32 %v831_v40, %v706_v32  ;;  %v833_v4 = vpop.f32.mrb[2].mxu0 }
 0x15d   :  { %v3053_v5 = vadd.f32 %v833_v4, %v708_v38  ;;  %v835_v41 = vpop.f32.mrb[3].mxu0  ;;  %v730_v4 = vadd.f32 %v3682_v31, %v3680_v21 }
 0x15e   :  { %v858_v27 = vmax.f32 %v3049_v39, %v3051_v37  ;;  %v3055_v6 = vadd.f32 %v835_v41, %v710_v36 }
 0x160   :  { %v870_v42 = vcombine.high %v858_v27, %v858_v27  ;;  %v877_v43 = vrot.slane %v858_v27, %v3686_v35  ;;  %v859_v44 = vmax.f32 %v3053_v5, %v3055_v6 }
 0x162   :  { %v884_v50 = vrot.slane %v870_v42, %v3686_v35  ;;  %v885_v51 = vcombine.high %v877_v43, %v877_v43  ;;  %v2716_v52 = vrot.slane %v877_v43, 9  ;;  %v887_v53 = vcombine.high %v859_v44, %v859_v44  ;;  %v839_v54 = vpop.f32.mrb[4].mxu0 }
 0x163   :  { %v894_v55 = vrot.slane %v859_v44, %v3686_v35  ;;  %v3057_v56 = vadd.f32 %v839_v54, %v714_v25  ;;  %v841_v57 = vpop.f32.mrb[5].mxu0 }
 0x164   :  { %v886_v60 = vcombine.high %v884_v50, %v884_v50  ;;  %v2717_v61 = vrot.slane %v885_v51, 9  ;;  %v2718_v62 = vrot.slane %v884_v50, 9  ;;  %v1068_v63 = vmax.f32 %v877_v43, %v2716_v52  ;;  %v843_v0 = vpop.f32.mrb[6].mxu0 }
 0x165   :  { %v901_v1 = vrot.slane %v887_v53, %v3686_v35  ;;  %v902_v2 = vcombine.high %v894_v55, %v894_v55  ;;  %v2720_v3 = vrot.slane %v894_v55, 9  ;;  %v3059_v48 = vadd.f32 %v841_v57, %v716_v45  ;;  %v845_v7 = vpop.f32.mrb[7].mxu0 }
 0x166   :  { %v2719_v8 = vrot.slane %v886_v60, 9  ;;  %v1069_v9 = vmax.f32 %v885_v51, %v2717_v61  ;;  %v1070_v10 = vmax.f32 %v884_v50, %v2718_v62  ;;  %v1092_v11 = vmax.f32 %v1068_v63, 0.0 }
 0x167   :  { %v903_v13 = vcombine.high %v901_v1, %v901_v1  ;;  %v2721_v14 = vrot.slane %v902_v2, 9  ;;  %v2722_v15 = vrot.slane %v901_v1, 9  ;;  %v1072_v17 = vmax.f32 %v894_v55, %v2720_v3 }
 0x168   :  { %v1071_v18 = vmax.f32 %v886_v60, %v2719_v8  ;;  %v1093_v20 = vmax.f32 %v1069_v9, 0.0  ;;  %v1094_v22 = vmax.f32 %v1070_v10, 0.0  ;;  %v1135_v24 = vrot.slane %v1092_v11, %v3671_v16 }
 0x169   :  { %v2723_v26 = vrot.slane %v903_v13, 9  ;;  %v1073_v28 = vmax.f32 %v902_v2, %v2721_v14  ;;  %v1074_v29 = vmax.f32 %v901_v1, %v2722_v15  ;;  %v1096_v30 = vmax.f32 %v1072_v17, 0.0 }
 0x16a   :  { %v1095_v32 = vmax.f32 %v1071_v18, 0.0  ;;  %v1139_v33 = vrot.slane %v1093_v20, %v3671_v16  ;;  %v1143_v34 = vrot.slane %v1094_v22, %v3671_v16  ;;  %v860_v38 = vmax.f32 %v3057_v56, %v3059_v48  ;;  %v849_v39 = vpop.f32.mrb[8].mxu0 }
 0x16b   :  { %v1075_v40 = vmax.f32 %v903_v13, %v2723_v26  ;;  %v1097_v36 = vmax.f32 %v1073_v28, 0.0  ;;  %v1098_v37 = vmax.f32 %v1074_v29, 0.0  ;;  %v851_v5 = vpop.f32.mrb[9].mxu0  ;;  %v3712_v6 = vrot.slane %v1096_v30, %v3671_v16 }
 0x16c   :  { %v3708_v41 = vrot.slane %v1095_v32, %v3671_v16  ;;  %v1197_v27 = vsel %vm1196_vm4, %v1139_v33, %v1135_v24  ;;  %v904_v25 = vcombine.high %v860_v38, %v860_v38  ;;  %v853_v42 = vpop.f32.mrb[10].mxu0  ;;  %v1229_v44 = vsel %vm1196_vm4, %v1143_v34, %v1139_v33 }
 0x16d   :  { %v1199_v43 = vsel %vm1198_vm5, %v1143_v34, %v1197_v27  ;;  %v1099_v45 = vmax.f32 %v1075_v40, 0.0  ;;  %v3717_v50 = vrot.slane %v1097_v36, %v3671_v16  ;;  %v855_v21 = vpop.f32.mrb[11].mxu0  ;;  %v3724_v51 = vrot.slane %v1098_v37, %v3671_v16 }
 0x16e   :  { %v3721_v31 = vsel %vm1196_vm4, %v3708_v41, %v1143_v34  ;;  %v911_v52 = vrot.slane %v860_v38, %v3686_v35  ;;  %v918_v53 = vrot.slane %v904_v25, %v3686_v35  ;;  %v3730_v54 = vsel %vm1200_vm6, %v3708_v41, %v1199_v43 }
 0x16f   :  { %v3061_v55 = vadd.f32 %v843_v0, %v3691_v46  ;;  %v3063_v56 = vadd.f32 %v845_v7, %v3694_v47  ;;  %v3065_v57 = vadd.f32 %v849_v39, %v3696_v49  ;;  %v3067_v2 = vadd.f32 %v851_v5, %v726_v58 }
 0x170   :  { %v919_v60 = vcombine.high %v911_v52, %v911_v52  ;;  %v920_v61 = vcombine.high %v918_v53, %v918_v53  ;;  %v2724_v62 = vrot.slane %v911_v52, 9  ;;  %v2726_v63 = vrot.slane %v918_v53, 9 }
 0x171   :  { %v861_v1 = vmax.f32 %v3061_v55, %v3063_v56  ;;  %v3069_v3 = vadd.f32 %v853_v42, %v728_v59  ;;  %v3071_v48 = vadd.f32 %v855_v21, %v730_v4  ;;  %v3736_v8 = vrot.slane %v1099_v45, %v3671_v16 }
 0x172   :  { %v2725_v9 = vrot.slane %v919_v60, 9  ;;  %v2727_v10 = vrot.slane %v920_v61, 9  ;;  %v1076_v11 = vmax.f32 %v911_v52, %v2724_v62  ;;  %v862_v47 = vmax.f32 %v3065_v57, %v3067_v2 }
 0x173   :  { %v921_v13 = vcombine.high %v861_v1, %v861_v1  ;;  %v928_v46 = vrot.slane %v861_v1, %v3686_v35  ;;  %v863_v0 = vmax.f32 %v3069_v3, %v3071_v48  ;;  %v3741_v7 = vmax.f32 %v918_v53, %v2726_v63 }
 0x174   :  { %v3739_v49 = vmax.f32 %v919_v60, %v2725_v9  ;;  %v3743_v14 = vmax.f32 %v920_v61, %v2727_v10  ;;  %v1100_v58 = vmax.f32 %v1076_v11, 0.0  ;;  %v938_v18 = vcombine.high %v862_v47, %v862_v47 }
 0x175   :  { %v935_v59 = vrot.slane %v921_v13, %v3686_v35  ;;  %v936_v15 = vcombine.high %v928_v46, %v928_v46  ;;  %v2728_v17 = vrot.slane %v928_v46, 9  ;;  %v945_v24 = vrot.slane %v862_v47, %v3686_v35 }
 0x176   :  { %v1101_v20 = vmax.f32 %v3739_v49, 0.0  ;;  %v1103_v22 = vmax.f32 %v3743_v14, 0.0  ;;  %v1230_v26 = vsel %vm1198_vm5, %v3708_v41, %v1229_v44  ;;  %v952_v33 = vrot.slane %v938_v18, %v3686_v35  ;;  %v3362_v14 = vld [vmem:[%s4138_s5 + $0x8] sm:$0xff]  }
 0x177   :  { %v937_v28 = vcombine.high %v935_v59, %v935_v59  ;;  %v2729_v29 = vrot.slane %v936_v15, 9  ;;  %v2730_v30 = vrot.slane %v935_v59, 9  ;;  %v1080_v32 = vmax.f32 %v928_v46, %v2728_v17 }
 0x178   :  { %v953_v34 = vcombine.high %v945_v24, %v945_v24  ;;  %v2732_v38 = vrot.slane %v945_v24, 9  ;;  %v955_v39 = vcombine.high %v863_v0, %v863_v0  ;;  %v954_v5 = vcombine.high %v952_v33, %v952_v33 }
 0x179   :  { %v2731_v40 = vrot.slane %v937_v28, 9  ;;  %v1081_v36 = vmax.f32 %v936_v15, %v2729_v29  ;;  %v1082_v37 = vmax.f32 %v935_v59, %v2730_v30  ;;  %v1104_v4 = vmax.f32 %v1080_v32, 0.0 }
 0x17a   :  { %v2733_v27 = vrot.slane %v953_v34, 9  ;;  %v2734_v25 = vrot.slane %v952_v33, 9  ;;  %v1084_v42 = vmax.f32 %v945_v24, %v2732_v38  ;;  %v2735_v52 = vrot.slane %v954_v5, 9 }
 0x17b   :  { %v1083_v43 = vmax.f32 %v937_v28, %v2731_v40  ;;  %v1105_v44 = vmax.f32 %v1081_v36, 0.0  ;;  %v1106_v45 = vmax.f32 %v1082_v37, 0.0  ;;  %v1167_v21 = vrot.slane %v1104_v4, %v3671_v16 }
 0x17c   :  { %v1085_v53 = vmax.f32 %v953_v34, %v2733_v27  ;;  %v1086_v55 = vmax.f32 %v952_v33, %v2734_v25  ;;  %v1108_v56 = vmax.f32 %v1084_v42, 0.0  ;;  %v962_v62 = vrot.slane %v863_v0, %v3686_v35 }
 0x17d   :  { %v1107_v57 = vmax.f32 %v1083_v43, 0.0  ;;  %v1171_v60 = vrot.slane %v1105_v44, %v3671_v16  ;;  %v1175_v61 = vrot.slane %v1106_v45, %v3671_v16  ;;  %v3757_v63 = vrot.slane %v1100_v58, %v3671_v16 }
 0x17e   :  { %v1087_v1 = vmax.f32 %v954_v5, %v2735_v52  ;;  %v1109_v2 = vmax.f32 %v1085_v53, 0.0  ;;  %v1110_v3 = vmax.f32 %v1086_v55, 0.0  ;;  %v3762_v10 = vrot.slane %v1108_v56, %v3671_v16 }
 0x17f   :  { %v1179_v48 = vrot.slane %v1107_v57, %v3671_v16  ;;  %v1210_v9 = vsel %vm1196_vm4, %v1171_v60, %v1167_v21  ;;  %v969_v11 = vrot.slane %v955_v39, %v3686_v35  ;;  %v1236_v46 = vsel %vm1196_vm4, %v1175_v61, %v1171_v60 }
 0x180   :  { %v1211_v13 = vsel %vm1198_vm5, %v1175_v61, %v1210_v9  ;;  %v1111_v47 = vmax.f32 %v1087_v1, 0.0  ;;  %v3768_v0 = vrot.slane %v1109_v2, %v3671_v16  ;;  %v3772_v59 = vrot.slane %v1110_v3, %v3671_v16 }
 0x181   :  { %v1262_v58 = vsel %vm1196_vm4, %v1179_v48, %v1175_v61  ;;  %v970_v15 = vcombine.high %v962_v62, %v962_v62  ;;  %v971_v17 = vcombine.high %v969_v11, %v969_v11  ;;  %v2736_v24 = vrot.slane %v962_v62, 9 }
 0x182   :  { %v3775_v18 = vrot.slane %v1111_v47, %v3671_v16  ;;  %v2738_v28 = vrot.slane %v969_v11, 9  ;;  %v1231_v29 = vsel %vm1200_vm6, %v3712_v6, %v1230_v26  ;;  %v1237_v34 = vsel %vm1198_vm5, %v1179_v48, %v1236_v46 }
 0x183   :  { %v2737_v30 = vrot.slane %v970_v15, 9  ;;  %v2739_v32 = vrot.slane %v971_v17, 9  ;;  %v1232_v33 = vsel %vm1202_vm7, %v3717_v50, %v1231_v29  ;;  %v1212_v38 = vsel %vm1200_vm6, %v1179_v48, %v1211_v13 }
 0x184   :  { %v1088_v39 = vmax.f32 %v962_v62, %v2736_v24  ;;  %v1233_v40 = vsel %vm1204_vm8, %v3724_v51, %v1232_v33  ;;  %v1238_v36 = vsel %vm1200_vm6, %v3762_v10, %v1237_v34  ;;  %v1090_v4 = vmax.f32 %v969_v11, %v2738_v28  ;;  %v3289_v11 = vld [vmem:[#allocation5 + $0x100] ss:$8 sps:$4 sm:$0xff]  }
 0x185   :  { %v1089_v37 = vmax.f32 %v970_v15, %v2737_v30  ;;  %v1234_v26 = vsel %vm1206_vm9, %v3736_v8, %v1233_v40  ;;  %v1239_v5 = vsel %vm1202_vm7, %v3768_v0, %v1238_v36  ;;  %v1203_v43 = vsel %vm1202_vm7, %v3712_v6, %v3730_v54 }
 0x186   :  { %v1112_v27 = vmax.f32 %v1088_v39, 0.0  ;;  %v1235_v25 = vsel %vm1208_vm10, %v3757_v63, %v1234_v26  ;;  %v1240_v42 = vsel %vm1204_vm8, %v3772_v59, %v1239_v5  ;;  %v3798_v44 = vmax.f32 %v971_v17, %v2739_v32  ;;  %v3294_v17 = vld [vmem:[#allocation5 + $0x114] ss:$8 sps:$4 sm:$0xff]  }
 0x187   :  { %v1113_v45 = vmax.f32 %v1089_v37, 0.0  ;;  %v1241_v21 = vsel %vm1206_vm9, %v3775_v18, %v1240_v42  ;;  %v1205_v52 = vsel %vm1204_vm8, %v3717_v50, %v1203_v43  ;;  %v1213_v56 = vsel %vm1202_vm7, %v3762_v10, %v1212_v38  ;;  %v3292_v38 = vld [vmem:[#allocation5 + $0x110] ss:$8 sps:$4 sm:$0xff]  }
 0x188   :  { %v3805_v53 = vrot.slane %v1112_v27, %v3671_v16  ;;  %v1207_v55 = vsel %vm1206_vm9, %v3724_v51, %v1205_v52  ;;  %v1102_v54 = vmax.f32 %v3741_v7, 0.0  ;;  %v1214_v60 = vsel %vm1204_vm8, %v3768_v0, %v1213_v56 }
 0x189   :  { %v1209_v57 = vsel %vm1208_vm10, %v3736_v8, %v1207_v55  ;;  %v1114_v61 = vmax.f32 %v1090_v4, 0.0  ;;  %v3819_v62 = vrot.slane %v1101_v20, %v3671_v16  ;;  %v1215_v2 = vsel %vm1206_vm9, %v3772_v59, %v1214_v60  ;;  %v3297_v4 = vld [vmem:[#allocation5 + $0x124] ss:$8 sps:$4 sm:$0xff]  }
 0x18a   :  { %v1242_v1 = vsel %vm1208_vm10, %v3805_v53, %v1241_v21  ;;  %v3826_v7 = vrot.slane %v1113_v45, %v3671_v16  ;;  %v3829_v3 = vrot.slane %v1102_v54, %v3671_v16  ;;  %v1216_v13 = vsel %vm1208_vm10, %v3775_v18, %v1215_v2  ;;  %v3361_v55 = vld [vmem:[%s4138_s5] sm:$0xff]  }
 0x18b   :  { %v1324_v9 = vpack.c.bf16 %v1242_v1, %v1235_v25  ;;  %v3834_v49 = vrot.slane %v1114_v61, %v3671_v16  ;;  %v1281_v20 = vsel %vm1196_vm4, %v3712_v6, %v3708_v41  ;;  %v1323_v46 = vpack.c.bf16 %v1216_v13, %v1209_v57  ;;  %v3295_v54 = vld [vmem:[#allocation5 + $0x120] ss:$8 sps:$4 sm:$0xff]   ;;  %v3300_v61 = vld [vmem:[#allocation5 + $0x134] ss:$8 sps:$4 sm:$0xff]  }
 0x18c   :  { %v1282_v47 = vsel %vm1198_vm5, %v3717_v50, %v1281_v20  ;;  %v1288_v15 = vsel %vm1196_vm4, %v3762_v10, %v1179_v48  ;;  %v1256_v24 = vsel %vm1198_vm5, %v3712_v6, %v3721_v31  ;;  %v1263_v30 = vsel %vm1198_vm5, %v3762_v10, %v1262_v58 }
 0x18d   :  { %1852 = vmatprep.mubr.bf16.mxu1 %v1324_v9  ;;  %v1283_v28 = vsel %vm1200_vm6, %v3724_v51, %v1282_v47  ;;  %v1289_v29 = vsel %vm1198_vm5, %v3768_v0, %v1288_v15  ;;  %v1257_v41 = vsel %vm1200_vm6, %v3717_v50, %v1256_v24  ;;  %v1264_v33 = vsel %vm1200_vm6, %v3768_v0, %v1263_v30  ;;  %v3307_v47 = vld [vmem:[#allocation5 + $0x160] ss:$8 sps:$4 sm:$0xff]   ;;  %v3312_v15 = vld [vmem:[#allocation5 + $0x174] ss:$8 sps:$4 sm:$0xff]   ;;  %v3315_v24 = vld [vmem:[#allocation5 + $0x184] ss:$8 sps:$4 sm:$0xff]  }
 0x18e   :  { %1853 = vmatmul.mubr.bf16.vlgmr.msra.gmra.mrb[12].mxu1 %v1323_v46  ;;  %v1284_v48 = vsel %vm1202_vm7, %v3736_v8, %v1283_v28  ;;  %v1290_v31 = vsel %vm1200_vm6, %v3772_v59, %v1289_v29  ;;  %v1258_v32 = vsel %vm1202_vm7, %v3724_v51, %v1257_v41  ;;  %v1265_v40 = vsel %vm1202_vm7, %v3772_v59, %v1264_v33  ;;  %v3306_v46 = vld [vmem:[#allocation5 + $0x154] ss:$8 sps:$4 sm:$0xff]   ;;  %v3313_v28 = vld [vmem:[#allocation5 + $0x180] ss:$8 sps:$4 sm:$0xff]   ;;  %v3316_v41 = vld [vmem:[#allocation5 + $0x190] ss:$8 sps:$4 sm:$0xff]  }
 0x18f   :  { %1864 = vmatpush1.bf16.msra.mxu1 %v3289_v11  ;;  %v1285_v34 = vsel %vm1204_vm8, %v3757_v63, %v1284_v48  ;;  %v1291_v58 = vsel %vm1202_vm7, %v3775_v18, %v1290_v31  ;;  %v1259_v39 = vsel %vm1204_vm8, %v3736_v8, %v1258_v32  ;;  %v1266_v5 = vsel %vm1204_vm8, %v3775_v18, %v1265_v40  ;;  %v3318_v29 = vld [vmem:[#allocation5 + $0x194] ss:$8 sps:$4 sm:$0xff]   ;;  %v3321_v30 = vld [vmem:[#allocation5 + $0x1a4] ss:$8 sps:$4 sm:$0xff]   ;;  %v3319_v48 = vld [vmem:[#allocation5 + $0x1a0] ss:$8 sps:$4 sm:$0xff]  }
 0x190   :  { %v1286_v36 = vsel %vm1206_vm9, %v3819_v62, %v1285_v34  ;;  %v1292_v37 = vsel %vm1204_vm8, %v3805_v53, %v1291_v58  ;;  %1865 = vmatprep.subr.bf16.mxu1 %v3294_v17  ;;  %v1260_v26 = vsel %vm1206_vm9, %v3757_v63, %v1259_v39  ;;  %v1267_v43 = vsel %vm1206_vm9, %v3805_v53, %v1266_v5  ;;  %v3310_v17 = vld [vmem:[#allocation5 + $0x170] ss:$8 sps:$4 sm:$0xff]   ;;  %v3324_v31 = vld [vmem:[#allocation5 + $0x1b4] ss:$8 sps:$4 sm:$0xff]   ;;  %v3327_v33 = vld [vmem:[#allocation5 + $0x1c4] ss:$8 sps:$4 sm:$0xff]  }
 0x191   :  { %v1287_v27 = vsel %vm1208_vm10, %v3829_v3, %v1286_v36  ;;  %v1293_v25 = vsel %vm1206_vm9, %v3826_v7, %v1292_v37  ;;  %v3884_v42 = vsel %vm1208_vm10, %v3819_v62, %v1260_v26  ;;  %v1115_v45 = vmax.f32 %v3798_v44, 0.0  ;;  %v3322_v32 = vld [vmem:[#allocation5 + $0x1b0] ss:$8 sps:$4 sm:$0xff]   ;;  %v3325_v34 = vld [vmem:[#allocation5 + $0x1c0] ss:$8 sps:$4 sm:$0xff]  }
 0x192   :  { %v1294_v21 = vsel %vm1208_vm10, %v3834_v49, %v1293_v25  ;;  %v3893_v52 = vsel %vm1208_vm10, %v3826_v7, %v1267_v43  ;;  %v1307_v44 = vsel %vm1196_vm4, %v3717_v50, %v3712_v6  ;;  %v1314_v60 = vsel %vm1196_vm4, %v3768_v0, %v3762_v10  ;;  %v3330_v58 = vld [vmem:[#allocation5 + $0x1d4] ss:$8 sps:$4 sm:$0xff]   ;;  %v3333_v39 = vld [vmem:[#allocation5 + $0x1e4] ss:$8 sps:$4 sm:$0xff]   ;;  %v3331_v40 = vld [vmem:[#allocation5 + $0x1e0] ss:$8 sps:$4 sm:$0xff]  }
 0x193   :  { %v1326_v56 = vpack.c.bf16 %v1294_v21, %v1287_v27  ;;  %1866 = vmatpush1.bf16.msra.mxu1 %v3292_v38  ;;  %v1325_v57 = vpack.c.bf16 %v3893_v52, %v3884_v42  ;;  %v1308_v1 = vsel %vm1198_vm5, %v3724_v51, %v1307_v44  ;;  %v1315_v2 = vsel %vm1198_vm5, %v3772_v59, %v1314_v60  ;;  %v3328_v38 = vld [vmem:[#allocation5 + $0x1d0] ss:$8 sps:$4 sm:$0xff]   ;;  %v3336_v36 = vld [vmem:[#allocation5 + $0x1f4] ss:$8 sps:$4 sm:$0xff]   ;;  %v3337_v26 = vld [vmem:[#allocation5 + $0x200] ss:$8 sps:$4 sm:$0xff]  }
 0x194   :  { %1867 = vmatprep.subr.bf16.mxu1 %v3297_v4  ;;  %v1302_v9 = vrot.slane %v1103_v22, %v3671_v16  ;;  %v1309_v6 = vsel %vm1200_vm6, %v3736_v8, %v1308_v1  ;;  %v1316_v50 = vsel %vm1200_vm6, %v3775_v18, %v1315_v2  ;;  %v3475_v10 = vmov 0.0   ;;  %v3298_v22 = vld [vmem:[#allocation5 + $0x130] ss:$8 sps:$4 sm:$0xff]   ;;  %v3339_v4 = vld [vmem:[#allocation5 + $0x204] ss:$8 sps:$4 sm:$0xff]  }
 0x195   :  { %1895 = vmatprep.mubr.bf16.mxu1 %v1326_v56  ;;  %2956 = vmatprep.subr.bf16.mxu0 %v3475_v10  ;;  %v1310_v51 = vsel %vm1202_vm7, %v3757_v63, %v1309_v6  ;;  %v1317_v0 = vsel %vm1202_vm7, %v3805_v53, %v1316_v50  ;;  %v1306_v8 = vrot.slane %v1115_v45, %v3671_v16  ;;  %v3303_v63 = vld [vmem:[#allocation5 + $0x144] ss:$8 sps:$4 sm:$0xff]   ;;  %v3334_v37 = vld [vmem:[#allocation5 + $0x1f0] ss:$8 sps:$4 sm:$0xff]   ;;  %v3342_v5 = vld [vmem:[#allocation5 + $0x214] ss:$8 sps:$4 sm:$0xff]  }
 0x196   :  { %2957 = vmatpush3.bf16.msra.mxu0 %v3361_v55  ;;  %v1311_v59 = vsel %vm1204_vm8, %v3819_v62, %v1310_v51  ;;  %v1318_v18 = vsel %vm1204_vm8, %v3826_v7, %v1317_v0  ;;  %v3301_v7 = vld [vmem:[#allocation5 + $0x140] ss:$8 sps:$4 sm:$0xff]   ;;  %v3340_v27 = vld [vmem:[#allocation5 + $0x210] ss:$8 sps:$4 sm:$0xff]   ;;  %v3345_v25 = vld [vmem:[#allocation5 + $0x224] ss:$8 sps:$4 sm:$0xff]   ;;  %2972 = vmatprep.mubr.msk.bf16.mxu0 %vm3476_vm11, %v3475_v10 }
 0x197   :  { %1868 = vmatpush1.bf16.msra.mxu1 %v3295_v54  ;;  %2958 = vmatprep.subr.bf16.mxu0 %v3475_v10  ;;  %v1312_v53 = vsel %vm1206_vm9, %v3829_v3, %v1311_v59  ;;  %v1319_v11 = vsel %vm1206_vm9, %v3834_v49, %v1318_v18  ;;  %v3304_v3 = vld [vmem:[#allocation5 + $0x150] ss:$8 sps:$4 sm:$0xff]   ;;  %v3309_v49 = vld [vmem:[#allocation5 + $0x164] ss:$8 sps:$4 sm:$0xff]   ;;  %v3343_v43 = vld [vmem:[#allocation5 + $0x220] ss:$8 sps:$4 sm:$0xff]  }
 0x198   :  { %1869 = vmatprep.subr.bf16.mxu1 %v3300_v61  ;;  %v3936_v13 = vsel %vm1208_vm10, %v1302_v9, %v1312_v53  ;;  %v3939_v20 = vsel %vm1208_vm10, %v1306_v8, %v1319_v11  ;;  %v3348_v45 = vld [vmem:[#allocation5 + $0x234] ss:$8 sps:$4 sm:$0xff]   ;;  %v3346_v21 = vld [vmem:[#allocation5 + $0x230] ss:$8 sps:$4 sm:$0xff]   ;;  %v3351_v55 = vld [vmem:[#allocation5 + $0x244] ss:$8 sps:$4 sm:$0xff]  }
 0x199   :  { %v1327_v62 = vpack.c.bf16 %v3939_v20, %v3936_v13  ;;  %v3349_v56 = vld [vmem:[#allocation5 + $0x240] ss:$8 sps:$4 sm:$0xff]   ;;  %v3354_v54 = vld [vmem:[#allocation5 + $0x254] ss:$8 sps:$4 sm:$0xff]   ;;  %v3352_v42 = vld [vmem:[#allocation5 + $0x250] ss:$8 sps:$4 sm:$0xff]  }
 0x19a   :  { %2959 = vmatpush3.bf16.msra.mxu0 %v3362_v14  ;;  %v3357_v52 = vld [vmem:[#allocation5 + $0x264] ss:$8 sps:$4 sm:$0xff]   ;;  %v3358_v44 = vld [vmem:[#allocation5 + $0x270] ss:$8 sps:$4 sm:$0xff]   ;;  %v1408_v50 = vld [vmem:[%s4137_s4] sm:$0x3] }
 0x19b   :  { %1870 = vmatpush1.bf16.msra.mxu1 %v3298_v22  ;;  %2960 = vmatprep.subr.bf16.mxu0 %v3475_v10  ;;  %v3363_v60 = vld [vmem:[%s4138_s5 + $0x10] sm:$0xff]   ;;  %v3364_v61 = vld [vmem:[%s4138_s5 + $0x18] sm:$0xff]   ;;  %v3365_v1 = vld [vmem:[%s4138_s5 + $0x20] sm:$0xff]   ;;  %v1413_v14 = vrot.slane %v1408_v50, %v3671_v16  ;;  %v1417_v22 = vrot.slane %v1408_v50, %v265_v19 }
 0x19c   :  { %1871 = vmatprep.subr.bf16.mxu1 %v3303_v63  ;;  %v3366_v2 = vld [vmem:[%s4138_s5 + $0x28] sm:$0xff]   ;;  %v3367_v9 = vld [vmem:[%s4138_s5 + $0x30] sm:$0xff]   ;;  %v3368_v6 = vld [vmem:[%s4138_s5 + $0x38] sm:$0xff]  }
 0x19d   :  { %v3393_v51 = vld [vmem:[%s4140_s7] sm:$0xff]   ;;  %v3394_v0 = vld [vmem:[%s4140_s7 + $0x8] sm:$0xff]  }
 0x19e   :  { %2961 = vmatpush3.bf16.msra.mxu0 %v3363_v60 }
 0x19f   :  { %1872 = vmatpush1.bf16.msra.mxu1 %v3301_v7  ;;  %2962 = vmatprep.subr.bf16.mxu0 %v3475_v10 }
 0x1a0   :  { %1873 = vmatprep.subr.bf16.mxu1 %v3306_v46 }
 0x1a2   :  { %2963 = vmatpush3.bf16.msra.mxu0 %v3364_v61 }
 0x1a3   :  { %1874 = vmatpush1.bf16.msra.mxu1 %v3304_v3  ;;  %2964 = vmatprep.subr.bf16.mxu0 %v3475_v10 }
 0x1a4   :  { %1875 = vmatprep.subr.bf16.mxu1 %v3309_v49 }
 0x1a6   :  { %2965 = vmatpush3.bf16.msra.mxu0 %v3365_v1 }
 0x1a7   :  { %1876 = vmatpush1.bf16.msra.mxu1 %v3307_v47  ;;  %2966 = vmatprep.subr.bf16.mxu0 %v3475_v10 }
 0x1a8   :  { %1877 = vmatprep.subr.bf16.mxu1 %v3312_v15 }
 0x1aa   :  { %2967 = vmatpush3.bf16.msra.mxu0 %v3366_v2 }
 0x1ab   :  { %1878 = vmatpush1.bf16.msra.mxu1 %v3310_v17  ;;  %2968 = vmatprep.subr.bf16.mxu0 %v3475_v10 }
 0x1ac   :  { %1879 = vmatprep.subr.bf16.mxu1 %v3315_v24 }
 0x1ae   :  { %2969 = vmatpush3.bf16.msra.mxu0 %v3367_v9 }
 0x1af   :  { %1880 = vmatpush1.bf16.msra.mxu1 %v3313_v28  ;;  %2970 = vmatprep.subr.bf16.mxu0 %v3475_v10 }
 0x1b0   :  { %1881 = vmatprep.subr.bf16.mxu1 %v3318_v29 }
 0x1b2   :  { %2971 = vmatpush3.bf16.msra.mxu0 %v3368_v6 }
 0x1b3   :  { %1882 = vmatpush1.bf16.msra.mxu1 %v3316_v41  ;;  %2976 = vmatprep.subr.bf16.mxu0 %v3475_v10 }
 0x1b4   :  { %1883 = vmatprep.subr.bf16.mxu1 %v3321_v30 }
 0x1b7   :  { %1884 = vmatpush1.bf16.msra.mxu1 %v3319_v48 }
 0x1b8   :  { %1885 = vmatprep.subr.bf16.mxu1 %v3324_v31 }
 0x1bb   :  { %1886 = vmatpush1.bf16.msra.mxu1 %v3322_v32 }
 0x1bc   :  { %1887 = vmatprep.subr.bf16.mxu1 %v3327_v33 }
 0x1bf   :  { %1888 = vmatpush1.bf16.msra.mxu1 %v3325_v34 }
 0x1c0   :  { %1889 = vmatprep.subr.bf16.mxu1 %v3330_v58 }
 0x1c3   :  { %1890 = vmatpush1.bf16.msra.mxu1 %v3328_v38 }
 0x1c4   :  { %1891 = vmatprep.subr.bf16.mxu1 %v3333_v39 }
 0x1c7   :  { %1892 = vmatpush1.bf16.msra.mxu1 %v3331_v40 }
 0x1c8   :  { %1893 = vmatprep.subr.bf16.mxu1 %v3336_v36 }
 0x1cb   :  { %1894 = vmatpush1.bf16.msra.mxu1 %v3334_v37 }
 0x1cc   :  { %1906 = vmatprep.subr.bf16.mxu1 %v3339_v4 }
 0x1ce   :  { %1896 = vmatmul.mubr.bf16.vlgmr.msra.gmra.mrb[12].mxu1 %v1325_v57  ;;  %v3360_v57 = vld [vmem:[#allocation5 + $0x274] ss:$8 sps:$4 sm:$0xff]  }
 0x1cf   :  { %1907 = vmatpush1.bf16.msra.mxu1 %v3337_v26  ;;  %1938 = vmatprep.mubr.bf16.mxu1 %v3473_v23  ;;  %v3355_v23 = vld [vmem:[#allocation5 + $0x260] ss:$8 sps:$4 sm:$0xff]  }
 0x1d0   :  { %1908 = vmatprep.subr.bf16.mxu1 %v3342_v5 }
 0x1d3   :  { %1909 = vmatpush1.bf16.msra.mxu1 %v3340_v27 }
 0x1d4   :  { %1910 = vmatprep.subr.bf16.mxu1 %v3345_v25 }
 0x1d7   :  { %1911 = vmatpush1.bf16.msra.mxu1 %v3343_v43 }
 0x1d8   :  { %1912 = vmatprep.subr.bf16.mxu1 %v3348_v45 }
 0x1db   :  { %1913 = vmatpush1.bf16.msra.mxu1 %v3346_v21 }
 0x1dc   :  { %1914 = vmatprep.subr.bf16.mxu1 %v3351_v55 }
 0x1df   :  { %1915 = vmatpush1.bf16.msra.mxu1 %v3349_v56 }
 0x1e0   :  { %1916 = vmatprep.subr.bf16.mxu1 %v3354_v54 }
 0x1e3   :  { %1917 = vmatpush1.bf16.msra.mxu1 %v3352_v42 }
 0x1e4   :  { %1918 = vmatprep.subr.bf16.mxu1 %v3357_v52 }
 0x1e7   :  { %1919 = vmatpush1.bf16.msra.mxu1 %v3355_v23 }
 0x1e8   :  { %1920 = vmatprep.subr.bf16.mxu1 %v3360_v57 }
 0x1eb   :  { %1921 = vmatpush1.bf16.msra.mxu1 %v3358_v44 }
 0x1ec   :  { %3036 = vmatprep.subr.bf16.mxu1 %v3475_v10 }
 0x1ee   :  { %1939 = vmatmul.mubr.bf16.vlgmr.msra.gmra.mrb[12].mxu1 %v1327_v62 }
 0x1ef   :  { %3044 = vmatprep.mubr.msk.bf16.mxu1 %vm3476_vm11, %v3475_v10  ;;  %3037 = vmatpush3.bf16.msra.mxu1 %v3393_v51 }
 0x1f0   :  { %3038 = vmatprep.subr.bf16.mxu1 %v3475_v10 }
 0x1f3   :  { %3039 = vmatpush3.bf16.msra.mxu1 %v3394_v0 }
 0x1f4   :  { %3040 = vmatprep.subr.bf16.mxu1 %v3475_v10 }
 0x2c1   :  { %v1940_v8 = vpop.f32.mrb[12].mxu1 }
 0x2c2   :  { %v3072_v59 = vadd.f32 %v1940_v8, %v1413_v14  ;;  %v1942_v18 = vpop.f32.mrb[13].mxu1 }
 0x2c3   :  { %v3073_v63 = vadd.f32 %v1942_v18, %v1417_v22  ;;  %v1944_v53 = vpop.f32.mrb[14].mxu1 }
 0x2c4   :  { %v3074_v11 = vadd.f32 %v1944_v53, %v1413_v14  ;;  %v1946_v13 = vpop.f32.mrb[15].mxu1  ;;  %v3369_v14 = vld [vmem:[%s4138_s5 + $0x40] sm:$0xff]  }
 0x2c5   :  { %v1949_v20 = vmax.f32 %v3072_v59, %v3073_v63  ;;  %v3075_v62 = vadd.f32 %v1946_v13, %v1417_v22 }
 0x2c7   :  { %v1953_v7 = vcombine.high %v1949_v20, %v1949_v20  ;;  %v1960_v16 = vrot.slane %v1949_v20, %v3686_v35  ;;  %v1950_v46 = vmax.f32 %v3074_v11, %v3075_v62  ;;  %v3370_v20 = vld [vmem:[%s4138_s5 + $0x48] sm:$0xff]  }
 0x2c9   :  { %v1967_v3 = vrot.slane %v1953_v7, %v3686_v35  ;;  %v1968_v49 = vcombine.high %v1960_v16, %v1960_v16  ;;  %v2820_v19 = vrot.slane %v1960_v16, 9  ;;  %v1970_v47 = vcombine.high %v1950_v46, %v1950_v46  ;;  %v3371_v7 = vld [vmem:[%s4138_s5 + $0x50] sm:$0xff]  }
 0x2ca   :  { %v1977_v15 = vrot.slane %v1950_v46, %v3686_v35  ;;  %v3373_v46 = vld [vmem:[%s4138_s5 + $0x60] sm:$0xff]  }
 0x2cb   :  { %v1969_v17 = vcombine.high %v1967_v3, %v1967_v3  ;;  %v2821_v24 = vrot.slane %v1968_v49, 9  ;;  %v2822_v28 = vrot.slane %v1967_v3, 9  ;;  %v2019_v29 = vmax.f32 %v1960_v16, %v2820_v19  ;;  %v3372_v16 = vld [vmem:[%s4138_s5 + $0x58] sm:$0xff]  }
 0x2cc   :  { %v1984_v41 = vrot.slane %v1970_v47, %v3686_v35  ;;  %v1985_v30 = vcombine.high %v1977_v15, %v1977_v15  ;;  %v2824_v48 = vrot.slane %v1977_v15, 9  ;;  %v3376_v19 = vld [vmem:[%s4138_s5 + $0x78] sm:$0xff]   ;;  %v3377_v47 = vld [vmem:[%s4138_s5 + $0x80] sm:$0xff]  }
 0x2cd   :  { %v2823_v31 = vrot.slane %v1969_v17, 9  ;;  %v2020_v32 = vmax.f32 %v1968_v49, %v2821_v24  ;;  %v2021_v33 = vmax.f32 %v1967_v3, %v2822_v28  ;;  %v2027_v34 = vmax.f32 %v2019_v29, 0.0  ;;  %v3374_v3 = vld [vmem:[%s4138_s5 + $0x68] sm:$0xff]   ;;  %v3375_v49 = vld [vmem:[%s4138_s5 + $0x70] sm:$0xff]   ;;  %v3380_v28 = vld [vmem:[%s4138_s5 + $0x98] sm:$0xff]  }
 0x2ce   :  { %v1986_v58 = vcombine.high %v1984_v41, %v1984_v41  ;;  %v2825_v38 = vrot.slane %v1985_v30, 9  ;;  %v2826_v39 = vrot.slane %v1984_v41, 9  ;;  %v2023_v40 = vmax.f32 %v1977_v15, %v2824_v48  ;;  %v3379_v24 = vld [vmem:[%s4138_s5 + $0x90] sm:$0xff]   ;;  %v3381_v29 = vld [vmem:[%s4138_s5 + $0xa0] sm:$0xff]   ;;  %v3384_v48 = vld [vmem:[%s4138_s5 + $0xb8] sm:$0xff]  }
 0x2cf   :  { %v2022_v36 = vmax.f32 %v1969_v17, %v2823_v31  ;;  %v2028_v37 = vmax.f32 %v2020_v32, 0.0  ;;  %v2029_v4 = vmax.f32 %v2021_v33, 0.0  ;;  %v2036_v43 = vpack.c.bf16 %v2027_v34, %v2027_v34  ;;  %v3378_v17 = vld [vmem:[%s4138_s5 + $0x88] sm:$0xff]   ;;  %v3385_v31 = vld [vmem:[%s4138_s5 + $0xc0] sm:$0xff]   ;;  %v3387_v34 = vld [vmem:[%s4138_s5 + $0xd0] sm:$0xff]  }
 0x2d0   :  { %v2827_v26 = vrot.slane %v1986_v58, 9  ;;  %v2024_v5 = vmax.f32 %v1985_v30, %v2825_v38  ;;  %v2025_v27 = vmax.f32 %v1984_v41, %v2826_v39  ;;  %v2031_v25 = vmax.f32 %v2023_v40, 0.0  ;;  %v3382_v41 = vld [vmem:[%s4138_s5 + $0xa8] sm:$0xff]   ;;  %v3383_v30 = vld [vmem:[%s4138_s5 + $0xb0] sm:$0xff]   ;;  %v3389_v38 = vld [vmem:[%s4138_s5 + $0xe0] sm:$0xff]  }
 0x2d1   :  { %v2030_v45 = vmax.f32 %v2022_v36, 0.0  ;;  %v2157_v54 = vpack.c.bf16 %v2028_v37, %v2028_v37  ;;  %v2273_v42 = vpack.c.bf16 %v2029_v4, %v2029_v4  ;;  %v2056_v60 = vunpack.c.l.b16 %v2036_v43  ;;  %v3386_v33 = vld [vmem:[%s4138_s5 + $0xc8] sm:$0xff]   ;;  %v3391_v40 = vld [vmem:[%s4138_s5 + $0xf0] sm:$0xff]   ;;  %v3392_v36 = vld [vmem:[%s4138_s5 + $0xf8] sm:$0xff]  }
 0x2d2   :  { %v2026_v35 = vmax.f32 %v1986_v58, %v2827_v26  ;;  %v2032_v21 = vmax.f32 %v2024_v5, 0.0  ;;  %v2033_v55 = vmax.f32 %v2025_v27, 0.0  ;;  %v2037_v56 = vpack.c.bf16 %v2031_v25, %v2031_v25  ;;  %v3388_v58 = vld [vmem:[%s4138_s5 + $0xd8] sm:$0xff]   ;;  %v3390_v39 = vld [vmem:[%s4138_s5 + $0xe8] sm:$0xff]   ;;  %v3395_v4 = vld [vmem:[%s4140_s7 + $0x10] sm:$0xff]  }
 0x2d3   :  { %v2389_v61 = vpack.c.bf16 %v2030_v45, %v2030_v45  ;;  %v2178_v50 = vunpack.c.l.b16 %v2157_v54  ;;  %v2294_v51 = vunpack.c.l.b16 %v2273_v42  ;;  %v3396_v26 = vld [vmem:[%s4140_s7 + $0x18] ss:$0 sps:$4 sm:$0x11]   ;;  %3041 = vmatpush3.bf16.msra.mxu1 %v3395_v4  ;;  %v2836_v27 = vld [vmem:[%s4139_s6] ss:$0 sm:$0xff]  ;;  %s3478_s6 = smov [#allocation7]  }
 0x2d4   :  { %v2034_v52 = vmax.f32 %v2026_v35, 0.0  ;;  %v2057_v23 = vunpack.c.l.b16 %v2037_v56  ;;  %v2158_v57 = vpack.c.bf16 %v2032_v21, %v2032_v21  ;;  %v2274_v44 = vpack.c.bf16 %v2033_v55, %v2033_v55  ;;  %3042 = vmatprep.subr.bf16.mxu1 %v3475_v10  ;;  %s2623_s0 = sshll.u32 %s3478_s6, 4  ;;  %s2624_s0 = int_to_ptr.vmem [resolvable:$true] %s2623_s0 }
 0x2d5   :  { %v2410_v11 = vunpack.c.l.b16 %v2389_v61  ;;  %v2548_v5 = vsel %vm2546_vm12, %v3396_v26, 0  ;;  %v3477_v54 = vmov 1966171168   ;;  %s3441_s28 = scalar_lea.vmem %s2624_s0, 32  ;;  %p3446_p3 = scmp.lt.s32.totalorder %s2624_s0, %s2624_s0 }
 0x2d6   :  { %v2058_v1 = vrot.slane %v2057_v23, 7  ;;  %v2179_v2 = vunpack.c.l.b16 %v2158_v57  ;;  %v2295_v9 = vunpack.c.l.b16 %v2274_v44  ;;  %v2390_v6 = vpack.c.bf16 %v2034_v52, %v2034_v52  ;;  %p3442_p2 = scmp.ne.s32.totalorder %s2624_s0, %s3441_s28  ;;  %p3447_p4 = scmp.lt.s32.totalorder %s3441_s28, %s3441_s28 }
 0x2d7   :  { %3043 = vmatpush3.bf16.msra.mxu1 %v2548_v5  ;;  %v2592_v42 = vunpack.c.l.s4 %v3477_v54 }
 0x2d8   :  { %v2059_v0 = vsel %vm1196_vm4, %v2058_v1, %v2056_v60  ;;  %v2180_v22 = vrot.slane %v2179_v2, 7  ;;  %v2296_v8 = vrot.slane %v2295_v9, 7  ;;  %v2411_v59 = vunpack.c.l.b16 %v2390_v6  ;;  %p3448_p5 = por %p3447_p4, %p3446_p3 }
 0x2d9   :  { %v2060_v18 = vpack.c.b16 %v2059_v0, %v2059_v0  ;;  %v2593_v52 = vunpack.c.0.s8 %v2592_v42 }
 0x2da   :  { %v2181_v63 = vsel %vm1196_vm4, %v2180_v22, %v2178_v50  ;;  %v2297_v53 = vsel %vm1196_vm4, %v2296_v8, %v2294_v51  ;;  %v2412_v13 = vrot.slane %v2411_v59, 7  ;;  %p3449_p6 = pnand %p3448_p5, %p3442_p2 }
 0x2db   :  { %2973 = vmatmul.mubr.bf16.vlgmr.msra.gmra.mrb[12].mxu0 %v2060_v18  ;;  %v2182_v15 = vpack.c.b16 %v2181_v63, %v2181_v63  ;;  %v2298_v32 = vpack.c.b16 %v2297_v53, %v2297_v53  ;;  %v2596_v23 = vsub.s32 %v2593_v52, %v3668_v12 }
 0x2dc   :  { %2977 = vmatpush3.bf16.msra.mxu0 %v3369_v14  ;;  %2992 = vmatprep.mubr.msk.bf16.mxu0 %vm3476_vm11, %v3475_v10  ;;  %v4010_v62 = vsel %vm1196_vm4, %v2412_v13, %v2410_v11 }
 0x2dd   :  { %2978 = vmatprep.subr.bf16.mxu0 %v3475_v10  ;;  %v2414_v37 = vpack.c.b16 %v4010_v62, %v4010_v62 }
 0x2e0   :  { %2979 = vmatpush3.bf16.msra.mxu0 %v3370_v20 }
 0x2e1   :  { %2980 = vmatprep.subr.bf16.mxu0 %v3475_v10 }
 0x2e4   :  { %2981 = vmatpush3.bf16.msra.mxu0 %v3371_v7 }
 0x2e5   :  { %2982 = vmatprep.subr.bf16.mxu0 %v3475_v10 }
 0x2e8   :  { %2983 = vmatpush3.bf16.msra.mxu0 %v3372_v16 }
 0x2e9   :  { %2984 = vmatprep.subr.bf16.mxu0 %v3475_v10 }
 0x2ec   :  { %2985 = vmatpush3.bf16.msra.mxu0 %v3373_v46 }
 0x2ed   :  { %2986 = vmatprep.subr.bf16.mxu0 %v3475_v10 }
 0x2f0   :  { %2987 = vmatpush3.bf16.msra.mxu0 %v3374_v3 }
 0x2f1   :  { %2988 = vmatprep.subr.bf16.mxu0 %v3475_v10 }
 0x2f4   :  { %2989 = vmatpush3.bf16.msra.mxu0 %v3375_v49 }
 0x2f5   :  { %2990 = vmatprep.subr.bf16.mxu0 %v3475_v10 }
 0x2f8   :  { %2991 = vmatpush3.bf16.msra.mxu0 %v3376_v19 }
 0x2f9   :  { %2996 = vmatprep.subr.bf16.mxu0 %v3475_v10 }
 0x2fb   :  { %2993 = vmatmul.mubr.bf16.vlgmr.msra.gmra.mrb[12].mxu0 %v2182_v15 }
 0x2fc   :  { %2997 = vmatpush3.bf16.msra.mxu0 %v3377_v47  ;;  %3012 = vmatprep.mubr.msk.bf16.mxu0 %vm3476_vm11, %v3475_v10 }
 0x2fd   :  { %2998 = vmatprep.subr.bf16.mxu0 %v3475_v10 }
 0x300   :  { %2999 = vmatpush3.bf16.msra.mxu0 %v3378_v17 }
 0x301   :  { %3000 = vmatprep.subr.bf16.mxu0 %v3475_v10 }
 0x304   :  { %3001 = vmatpush3.bf16.msra.mxu0 %v3379_v24 }
 0x305   :  { %3002 = vmatprep.subr.bf16.mxu0 %v3475_v10 }
 0x308   :  { %3003 = vmatpush3.bf16.msra.mxu0 %v3380_v28 }
 0x309   :  { %3004 = vmatprep.subr.bf16.mxu0 %v3475_v10 }
 0x30c   :  { %3005 = vmatpush3.bf16.msra.mxu0 %v3381_v29 }
 0x30d   :  { %3006 = vmatprep.subr.bf16.mxu0 %v3475_v10 }
 0x310   :  { %3007 = vmatpush3.bf16.msra.mxu0 %v3382_v41 }
 0x311   :  { %3008 = vmatprep.subr.bf16.mxu0 %v3475_v10 }
 0x314   :  { %3009 = vmatpush3.bf16.msra.mxu0 %v3383_v30 }
 0x315   :  { %3010 = vmatprep.subr.bf16.mxu0 %v3475_v10 }
 0x318   :  { %3011 = vmatpush3.bf16.msra.mxu0 %v3384_v48 }
 0x319   :  { %3016 = vmatprep.subr.bf16.mxu0 %v3475_v10 }
 0x31b   :  { %3013 = vmatmul.mubr.bf16.vlgmr.msra.gmra.mrb[12].mxu0 %v2298_v32 }
 0x31c   :  { %3017 = vmatpush3.bf16.msra.mxu0 %v3385_v31  ;;  %3032 = vmatprep.mubr.msk.bf16.mxu0 %vm3476_vm11, %v3475_v10 }
 0x31d   :  { %3018 = vmatprep.subr.bf16.mxu0 %v3475_v10 }
 0x320   :  { %3019 = vmatpush3.bf16.msra.mxu0 %v3386_v33 }
 0x321   :  { %3020 = vmatprep.subr.bf16.mxu0 %v3475_v10 }
 0x324   :  { %3021 = vmatpush3.bf16.msra.mxu0 %v3387_v34 }
 0x325   :  { %3022 = vmatprep.subr.bf16.mxu0 %v3475_v10 }
 0x328   :  { %3023 = vmatpush3.bf16.msra.mxu0 %v3388_v58 }
 0x329   :  { %3024 = vmatprep.subr.bf16.mxu0 %v3475_v10 }
 0x32c   :  { %3025 = vmatpush3.bf16.msra.mxu0 %v3389_v38 }
 0x32d   :  { %3026 = vmatprep.subr.bf16.mxu0 %v3475_v10 }
 0x330   :  { %3027 = vmatpush3.bf16.msra.mxu0 %v3390_v39 }
 0x331   :  { %3028 = vmatprep.subr.bf16.mxu0 %v3475_v10 }
 0x334   :  { %3029 = vmatpush3.bf16.msra.mxu0 %v3391_v40 }
 0x335   :  { %3030 = vmatprep.subr.bf16.mxu0 %v3475_v10  ;;  %v2909_v10 = vld [vmem:[%s4141_s8] ss:$0 sm:$0xff] }
 0x338   :  { %3031 = vmatpush3.bf16.msra.mxu0 %v3392_v36 }
 0x33b   :  { %3033 = vmatmul.mubr.bf16.vlgmr.msra.gmra.mrb[12].mxu0 %v2414_v37 }
 0x40e   :  { %v2498_v25 = vpop.f32.mrb[12].mxu0 }
 0x40f   :  { %v3076_v43 = vadd.f32 %v2836_v27, %v2498_v25  ;;  %v3034_v45 = vpop.f32.mrb[13].mxu0 }
 0x410   :  { %v2501_v35 = vpop.f32.mrb[14].mxu0 }
 0x411   :  { %v2505_v21 = vmax.f32 %v3076_v43, 0.0  ;;  %v3035_v55 = vpop.f32.mrb[15].mxu0 }
 0x413   :  { %v2506_v56 = vpack.c.bf16 %v2505_v21, %v2505_v21 }
 0x415   :  { %3045 = vmatmul.mubr.msk.bf16.vlgmr.msra.gmra.mrb[16].mxu1 %vm2542_vm13, %v2506_v56 }
 0x4e8   :  { %v2584_v57 = vpop.f32.mrb[16].mxu1 }
 0x4e9   :  { %v2585_v44 = vadd.f32 %v2909_v10, %v2584_v57  ;;  %v3046_v60 = vpop.f32.mrb[17].mxu1 }
 0x4ea   :  { %v2587_v61 = vpop.f32.mrb[18].mxu1 }
 0x4eb   :  { %v2597_v1 = vrot.slane %v2585_v44, %v2596_v23  ;;  %v3047_v2 = vpop.f32.mrb[19].mxu1 }
 0x4ed   :  { %v2598_v9 = vcombine.high %v2597_v1, %v2597_v1  ;;  %v2605_v6 = vrot.slane %v2597_v1, %v2596_v23 }
 0x4ef   :  { %v2612_v50 = vrot.slane %v2598_v9, %v2596_v23  ;;  %2616 = vst.msk [vmem:[#allocation7] sm:$0x1] %vm2615_vm14, %v2605_v6 }
 0x4f1   :  { %2617 = vst.msk [vmem:[#allocation7 + $0x1] sm:$0x1] %vm2615_vm14, %v2612_v50 }
 0x4f2   :  { %3452 = shalt.err (!%p3449_p6)
}
 0x4f3   :  { %s3453_s29 = scalar_lea.hbm %s4142_s9, 32 }
 0x4f4   :  { %p3454_p7 = scmp.ne.s32.totalorder %s4142_s9, %s3453_s29  ;;  %p3457_p8 = scmp.lt.u32.totalorder %s3453_s29, %s4142_s9 }
 0x4f6   :  { %p3459_p9 = pnand %p3457_p8, %p3454_p7 }
 0x4f8   :  { %3462 = shalt.err (!%p3459_p9)
}
 0x4f9   :  { %s3479_s10 = smov 16   ;;  %s3480_s3 = smov 1  }
 0x4fa   :  { %2629 = dma.vmem_to_hbm [thread:$0]  %s2624_s0, 32, %s4142_s9, [#allocation4], %s3479_s10, %s3479_s10, %s3480_s3  }
 0x4fb   :  { %3467 = dma.done.wait [#allocation4], 32  }
 0x4fc   :  { %3468 = vsyncadd [#allocation4], 4294967264 }
 0x4fd   :  { %2633 = vsyncpa [#allocation3], 1 }
 0x4fe   :  { %2634 = vsyncpa [#allocation6], 1 }
 0x4ff   :  { %2635 = vsyncpa [#allocation4], 1 }

</bundles_post_ra>
